<compile_context>
chip_gen: v7x
topology: tpu7x:2x2x1
jax: 0.10.0
libtpu: 0.0.40
codegen_flags: <defaults>
</compile_context>

<pallas_src>
import jax
import jax.numpy as jnp
from jax import lax
from jax.experimental import pallas as pl
from jax.experimental.pallas import tpu as pltpu

KSIZE = 31
PAD = 15
EPS = 1e-5          # PyTorch InstanceNorm1d default eps
MXU_K_TARGET = 256  # contraction-width target (v6e/v7x MXU; >=128 fills v5e)


def _round_up(v, m):
    return ((v + m - 1) // m) * m


def _grouping(cp):
    """Group G taps per matmul so the contraction K = G*Cp ~= MXU_K_TARGET."""
    g = min(KSIZE, max(1, (MXU_K_TARGET + cp - 1) // cp))
    ng = (KSIZE + g - 1) // g
    pad_k = ng * g - KSIZE      # zero-weight taps appended to fill the last group
    return g, ng, pad_k


def _group_weights(w, c, cp, g, ng):
    """(C_out, C_in, K) PyTorch conv weight -> (NG, Cp, G*Cp) bf16 tap groups.

    Group gi, slot j (tap t = gi*G + j) occupies columns [j*Cp, j*Cp+C) of
    row-block gi; padded channels / padded taps are zero.
    """
    w = jnp.asarray(w, jnp.float32)
    wg = jnp.zeros((ng, cp, g * cp), jnp.float32)
    for t in range(KSIZE):
        gi, j = divmod(t, g)
        wg = wg.at[gi, :c, j * cp:j * cp + c].set(w[:, :, t])
    return wg.astype(jnp.bfloat16)


def resblock_kernel(x_ref, w1_ref, w2_ref, p_ref, out_ref,
                    xs_ref, hs_ref, rbuf_ref):
    cp, wpad = xs_ref.shape
    lpad = out_ref.shape[2]
    c = x_ref.shape[1]
    l = x_ref.shape[2]
    ng = w1_ref.shape[0]
    g = rbuf_ref.shape[0] // cp
    f32 = jnp.float32

    # Stage the unpadded sample into a zero-padded f32 scratch (conv halo +
    # lane/sublane padding). Re-zeroed every step: cheap and megacore-safe.
    xs_ref[...] = jnp.zeros_like(xs_ref)
    xs_ref[0:c, PAD:PAD + l] = x_ref[0]
    hs_ref[...] = jnp.zeros_like(hs_ref)

    # Mask of valid length positions (lane padding excluded from IN stats).
    col = lax.broadcasted_iota(jnp.int32, (1, lpad), 1)
    mask = (col < l).astype(f32)
    inv_n = 1.0 / l

    def conv(w_ref, src_ref):
        # 31-tap conv as ceil(31/G) MXU matmuls with contraction K = G*Cp.
        # Tap slices are read straight from the padded VMEM scratch and cast
        # to bf16 while packed into the staging buffer. No conv bias: the
        # following InstanceNorm cancels any per-channel constant shift.
        acc = jnp.zeros((cp, lpad), f32)
        for gi in range(ng):
            for j in range(g):
                t = gi * g + j
                rbuf_ref[j * cp:(j + 1) * cp, :] = (
                    src_ref[:, t:t + lpad].astype(jnp.bfloat16))
            acc = acc + jnp.dot(w_ref[gi], rbuf_ref[...],
                                preferred_element_type=f32)
        return acc

    def inorm(acc, gamma, beta):
        # One-pass masked sum / sum-of-squares; affine folded to scale/shift.
        am = acc * mask
        s1 = jnp.sum(am, axis=-1, keepdims=True)
        s2 = jnp.sum(am * acc, axis=-1, keepdims=True)
        mean = s1 * inv_n
        var = jnp.maximum(s2 * inv_n - mean * mean, 0.0)
        scale = gamma * lax.rsqrt(var + EPS)
        shift = beta - scale * mean
        return acc * scale + shift

    g1, be1, g2, be2 = p_ref[0], p_ref[1], p_ref[2], p_ref[3]   # (Cp, 1) each

    # conv1 -> IN1 -> ReLU, stored (masked) into the padded h scratch so conv2
    # sees correct zero padding without a register-level concatenate.
    h = jnp.maximum(inorm(conv(w1_ref, xs_ref), g1, be1), 0.0)
    hs_ref[:, PAD:PAD + lpad] = (h * mask).astype(jnp.bfloat16)

    # conv2 -> IN2 -> residual add (residual re-read from the f32 scratch).
    y = inorm(conv(w2_ref, hs_ref), g2, be2)
    out_ref[0] = (y + xs_ref[:, PAD:PAD + lpad]).astype(out_ref.dtype)


def residual_block_pallas(x, params):
    """x: (N, C, L) float32; params: PyTorch-shaped ResidualBlock weights."""
    N, C, L = x.shape
    cp = _round_up(C, 8)            # sublane-dense channels
    lpad = _round_up(L, 128)        # lane-dense length
    g, ng, pad_k = _grouping(cp)
    wpad = lpad + 2 * PAD + pad_k   # scratch width: conv halo + tap-group pad

    w1g = _group_weights(params["w1"], C, cp, g, ng)
    w2g = _group_weights(params["w2"], C, cp, g, ng)

    # InstanceNorm affine params, channel-padded with zeros so padded channels
    # stay identically zero end-to-end. Conv biases b1/b2 are not passed:
    # InstanceNorm makes them no-ops.
    pvec = jnp.zeros((4, cp, 1), jnp.float32)
    pvec = pvec.at[0, :C, 0].set(jnp.asarray(params["g1"], jnp.float32))
    pvec = pvec.at[1, :C, 0].set(jnp.asarray(params["be1"], jnp.float32))
    pvec = pvec.at[2, :C, 0].set(jnp.asarray(params["g2"], jnp.float32))
    pvec = pvec.at[3, :C, 0].set(jnp.asarray(params["be2"], jnp.float32))

    const = lambda n: (0, 0, 0)

    out = pl.pallas_call(
        resblock_kernel,
        out_shape=jax.ShapeDtypeStruct((N, cp, lpad), x.dtype),
        grid_spec=pltpu.PrefetchScalarGridSpec(
            num_scalar_prefetch=0,
            grid=(N,),
            in_specs=[
                pl.BlockSpec((1, C, L), lambda n: (n, 0, 0)),   # unpadded x
                pl.BlockSpec((ng, cp, g * cp), const),          # conv1 w (bf16)
                pl.BlockSpec((ng, cp, g * cp), const),          # conv2 w (bf16)
                pl.BlockSpec((4, cp, 1), const),                # IN gamma/beta
            ],
            out_specs=pl.BlockSpec((1, cp, lpad), lambda n: (n, 0, 0)),
            scratch_shapes=[
                pltpu.VMEM((cp, wpad), jnp.float32),      # padded input sample
                pltpu.VMEM((cp, wpad), jnp.bfloat16),     # padded hidden act
                pltpu.VMEM((g * cp, lpad), jnp.bfloat16),  # matmul RHS staging
            ],
        ),
        compiler_params=pltpu.CompilerParams(
            dimension_semantics=("parallel",),
            vmem_limit_bytes=64 * 1024 * 1024,   # budget also valid on v7x
        ),
        # For very large C/L one would additionally single-buffer the constant
        # weight specs and tile L inside the kernel (two-pass IN); not needed
        # at these sizes.
    )(x, w1g, w2g, pvec)

    # Strip the lane/sublane padding added for dense (8,128) tiles.
    return out[:, :C, :L]


def residual_block_ref(x, p):
    """Plain-JAX reference matching the PyTorch forward (includes biases)."""
    def conv1d(x, w, b):
        y = lax.conv_general_dilated(
            x, w, window_strides=(1,), padding=[(PAD, PAD)],
            dimension_numbers=("NCH", "OIH", "NCH"))
        return y + b[None, :, None]

    def inorm(x, g, bta):
        m = jnp.mean(x, axis=-1, keepdims=True)
        v = jnp.mean((x - m) ** 2, axis=-1, keepdims=True)
        return g[None, :, None] * (x - m) / jnp.sqrt(v + EPS) + bta[None, :, None]

    h = jax.nn.relu(inorm(conv1d(x, p["w1"], p["b1"]), p["g1"], p["be1"]))
    o = inorm(conv1d(h, p["w2"], p["b2"]), p["g2"], p["be2"])
    return o + x


if __name__ == "__main__":
    N, C, L = 2, 4, 16
    key = jax.random.PRNGKey(0)
    kx, k1, k2, k3, k4 = jax.random.split(key, 5)

    x = jax.random.normal(kx, (N, C, L), dtype=jnp.float32)

    params = {
        # Conv1d weights: (C_out, C_in, K); InstanceNorm affine: weight=1, bias=0
        "w1": jax.random.normal(k1, (C, C, KSIZE), jnp.float32) * 0.1,
        "b1": jax.random.normal(k2, (C,), jnp.float32) * 0.1,
        "g1": jnp.ones((C,), jnp.float32),
        "be1": jnp.zeros((C,), jnp.float32),
        "w2": jax.random.normal(k3, (C, C, KSIZE), jnp.float32) * 0.1,
        "b2": jax.random.normal(k4, (C,), jnp.float32) * 0.1,
        "g2": jnp.ones((C,), jnp.float32),
        "be2": jnp.zeros((C,), jnp.float32),
    }

    out = jax.block_until_ready(residual_block_pallas(x, params))
    ref = jax.block_until_ready(residual_block_ref(x, params))

    err = float(jnp.max(jnp.abs(out - ref)))
    assert out.shape == (N, C, L)
    # Tolerance reflects bf16 MXU operands (accumulation/stats stay f32).
    assert err < 5e-2, f"mismatch vs reference: max abs err {err}"

    print("KERNEL_OK")
</pallas_src>

<mosaic_0001>
module attributes {stable_mosaic.version = 11 : i64} {
  func.func @resblock_kernel(%arg0: i32, %arg1: memref<1x4x16xf32, #tpu.memory_space<vmem>>, %arg2: memref<1x8x248xbf16, #tpu.memory_space<vmem>>, %arg3: memref<1x8x248xbf16, #tpu.memory_space<vmem>>, %arg4: memref<4x8x1xf32, #tpu.memory_space<vmem>>, %arg5: memref<1x8x128xf32, #tpu.memory_space<vmem>>, %arg6: memref<8x158xf32, #tpu.memory_space<vmem>>, %arg7: memref<8x158xbf16, #tpu.memory_space<vmem>>, %arg8: memref<248x128xbf16, #tpu.memory_space<vmem>>) attributes {dimension_semantics = [#tpu.dimension_semantics<parallel>], iteration_bounds = array<i64: 2>, scalar_prefetch = 0 : i64, scratch_operands = 3 : i64, tpu.core_type = #tpu.core_type<tc>, window_params = [{transform_indices = @transform_0, window_bounds = array<i64: 1, 4, 16>}, {pipeline_mode = #tpu.pipeline_mode<synchronous>, transform_indices = @transform_1, window_bounds = array<i64: 1, 8, 248>}, {pipeline_mode = #tpu.pipeline_mode<synchronous>, transform_indices = @transform_2, window_bounds = array<i64: 1, 8, 248>}, {pipeline_mode = #tpu.pipeline_mode<synchronous>, transform_indices = @transform_3, window_bounds = array<i64: 4, 8, 1>}, {transform_indices = @transform_4, window_bounds = array<i64: 1, 8, 128>}]} {
    %cst = arith.constant 0.000000e+00 : f32
    %0 = vector.broadcast %cst : f32 to vector<8x158xf32>
    %c0 = arith.constant 0 : index
    %c0_0 = arith.constant 0 : index
    %1 = vector.load %arg6[%c0, %c0_0] : memref<8x158xf32, #tpu.memory_space<vmem>>, vector<8x158xf32>
    tpu.vector_store %arg6[%c0, %c0_0], %0 {strides = array<i32>} : memref<8x158xf32, #tpu.memory_space<vmem>>, vector<8x158xf32>,
    %c0_1 = arith.constant 0 : index
    %c0_2 = arith.constant 0 : index
    %c0_3 = arith.constant 0 : index
    %2 = vector.load %arg1[%c0_1, %c0_2, %c0_3] : memref<1x4x16xf32, #tpu.memory_space<vmem>>, vector<1x4x16xf32>
    %3 = vector.shape_cast %2 : vector<1x4x16xf32> to vector<4x16xf32>
    %c0_4 = arith.constant 0 : index
    %c15 = arith.constant 15 : index
    %4 = vector.load %arg6[%c0_4, %c15] : memref<8x158xf32, #tpu.memory_space<vmem>>, vector<4x16xf32>
    tpu.vector_store %arg6[%c0_4, %c15], %3 {strides = array<i32>} : memref<8x158xf32, #tpu.memory_space<vmem>>, vector<4x16xf32>,
    %cst_5 = arith.constant 0.000000e+00 : bf16
    %5 = vector.broadcast %cst_5 : bf16 to vector<8x158xbf16>
    %c0_6 = arith.constant 0 : index
    %c0_7 = arith.constant 0 : index
    %6 = vector.load %arg7[%c0_6, %c0_7] : memref<8x158xbf16, #tpu.memory_space<vmem>>, vector<8x158xbf16>
    tpu.vector_store %arg7[%c0_6, %c0_7], %5 {strides = array<i32>} : memref<8x158xbf16, #tpu.memory_space<vmem>>, vector<8x158xbf16>,
    %7 = tpu.iota {dimensions = array<i32: 1>} : vector<1x128xi32>
    %c16_i32 = arith.constant 16 : i32
    %8 = vector.broadcast %c16_i32 : i32 to vector<1x128xi32>
    %9 = arith.cmpi slt, %7, %8 : vector<1x128xi32>
    %10 = arith.extui %9 : vector<1x128xi1> to vector<1x128xi32>
    %11 = arith.sitofp %10 : vector<1x128xi32> to vector<1x128xf32>
    %c0_8 = arith.constant 0 : index
    %c0_9 = arith.constant 0 : index
    %c0_10 = arith.constant 0 : index
    %12 = vector.load %arg4[%c0_8, %c0_9, %c0_10] : memref<4x8x1xf32, #tpu.memory_space<vmem>>, vector<1x8x1xf32>
    %13 = vector.shape_cast %12 : vector<1x8x1xf32> to vector<8x1xf32>
    %c1 = arith.constant 1 : index
    %c0_11 = arith.constant 0 : index
    %c0_12 = arith.constant 0 : index
    %14 = vector.load %arg4[%c1, %c0_11, %c0_12] : memref<4x8x1xf32, #tpu.memory_space<vmem>>, vector<1x8x1xf32>
    %15 = vector.shape_cast %14 : vector<1x8x1xf32> to vector<8x1xf32>
    %c2 = arith.constant 2 : index
    %c0_13 = arith.constant 0 : index
    %c0_14 = arith.constant 0 : index
    %16 = vector.load %arg4[%c2, %c0_13, %c0_14] : memref<4x8x1xf32, #tpu.memory_space<vmem>>, vector<1x8x1xf32>
    %17 = vector.shape_cast %16 : vector<1x8x1xf32> to vector<8x1xf32>
    %c3 = arith.constant 3 : index
    %c0_15 = arith.constant 0 : index
    %c0_16 = arith.constant 0 : index
    %18 = vector.load %arg4[%c3, %c0_15, %c0_16] : memref<4x8x1xf32, #tpu.memory_space<vmem>>, vector<1x8x1xf32>
    %19 = vector.shape_cast %18 : vector<1x8x1xf32> to vector<8x1xf32>
    %cst_17 = arith.constant 0.000000e+00 : f32
    %20 = vector.broadcast %cst_17 : f32 to vector<8x128xf32>
    %c0_18 = arith.constant 0 : index
    %c0_19 = arith.constant 0 : index
    %21 = vector.load %arg6[%c0_18, %c0_19] : memref<8x158xf32, #tpu.memory_space<vmem>>, vector<8x128xf32>
    %22 = arith.truncf %21 : vector<8x128xf32> to vector<8x128xbf16>
    %c0_20 = arith.constant 0 : index
    %c0_21 = arith.constant 0 : index
    %23 = vector.load %arg8[%c0_20, %c0_21] : memref<248x128xbf16, #tpu.memory_space<vmem>>, vector<8x128xbf16>
    tpu.vector_store %arg8[%c0_20, %c0_21], %22 {strides = array<i32>} : memref<248x128xbf16, #tpu.memory_space<vmem>>, vector<8x128xbf16>,
    %c0_22 = arith.constant 0 : index
    %c1_23 = arith.constant 1 : index
    %24 = vector.load %arg6[%c0_22, %c1_23] : memref<8x158xf32, #tpu.memory_space<vmem>>, vector<8x128xf32>
    %25 = arith.truncf %24 : vector<8x128xf32> to vector<8x128xbf16>
    %c8 = arith.constant 8 : index
    %c0_24 = arith.constant 0 : index
    %26 = vector.load %arg8[%c8, %c0_24] : memref<248x128xbf16, #tpu.memory_space<vmem>>, vector<8x128xbf16>
    tpu.vector_store %arg8[%c8, %c0_24], %25 {strides = array<i32>} : memref<248x128xbf16, #tpu.memory_space<vmem>>, vector<8x128xbf16>,
    %c0_25 = arith.constant 0 : index
    %c2_26 = arith.constant 2 : index
    %27 = vector.load %arg6[%c0_25, %c2_26] : memref<8x158xf32, #tpu.memory_space<vmem>>, vector<8x128xf32>
    %28 = arith.truncf %27 : vector<8x128xf32> to vector<8x128xbf16>
    %c16 = arith.constant 16 : index
    %c0_27 = arith.constant 0 : index
    %29 = vector.load %arg8[%c16, %c0_27] : memref<248x128xbf16, #tpu.memory_space<vmem>>, vector<8x128xbf16>
    tpu.vector_store %arg8[%c16, %c0_27], %28 {strides = array<i32>} : memref<248x128xbf16, #tpu.memory_space<vmem>>, vector<8x128xbf16>,
    %c0_28 = arith.constant 0 : index
    %c3_29 = arith.constant 3 : index
    %30 = vector.load %arg6[%c0_28, %c3_29] : memref<8x158xf32, #tpu.memory_space<vmem>>, vector<8x128xf32>
    %31 = arith.truncf %30 : vector<8x128xf32> to vector<8x128xbf16>
    %c24 = arith.constant 24 : index
    %c0_30 = arith.constant 0 : index
    %32 = vector.load %arg8[%c24, %c0_30] : memref<248x128xbf16, #tpu.memory_space<vmem>>, vector<8x128xbf16>
    tpu.vector_store %arg8[%c24, %c0_30], %31 {strides = array<i32>} : memref<248x128xbf16, #tpu.memory_space<vmem>>, vector<8x128xbf16>,
    %c0_31 = arith.constant 0 : index
    %c4 = arith.constant 4 : index
    %33 = vector.load %arg6[%c0_31, %c4] : memref<8x158xf32, #tpu.memory_space<vmem>>, vector<8x128xf32>
    %34 = arith.truncf %33 : vector<8x128xf32> to vector<8x128xbf16>
    %c32 = arith.constant 32 : index
    %c0_32 = arith.constant 0 : index
    %35 = vector.load %arg8[%c32, %c0_32] : memref<248x128xbf16, #tpu.memory_space<vmem>>, vector<8x128xbf16>
    tpu.vector_store %arg8[%c32, %c0_32], %34 {strides = array<i32>} : memref<248x128xbf16, #tpu.memory_space<vmem>>, vector<8x128xbf16>,
    %c0_33 = arith.constant 0 : index
    %c5 = arith.constant 5 : index
    %36 = vector.load %arg6[%c0_33, %c5] : memref<8x158xf32, #tpu.memory_space<vmem>>, vector<8x128xf32>
    %37 = arith.truncf %36 : vector<8x128xf32> to vector<8x128xbf16>
    %c40 = arith.constant 40 : index
    %c0_34 = arith.constant 0 : index
    %38 = vector.load %arg8[%c40, %c0_34] : memref<248x128xbf16, #tpu.memory_space<vmem>>, vector<8x128xbf16>
    tpu.vector_store %arg8[%c40, %c0_34], %37 {strides = array<i32>} : memref<248x128xbf16, #tpu.memory_space<vmem>>, vector<8x128xbf16>,
    %c0_35 = arith.constant 0 : index
    %c6 = arith.constant 6 : index
    %39 = vector.load %arg6[%c0_35, %c6] : memref<8x158xf32, #tpu.memory_space<vmem>>, vector<8x128xf32>
    %40 = arith.truncf %39 : vector<8x128xf32> to vector<8x128xbf16>
    %c48 = arith.constant 48 : index
    %c0_36 = arith.constant 0 : index
    %41 = vector.load %arg8[%c48, %c0_36] : memref<248x128xbf16, #tpu.memory_space<vmem>>, vector<8x128xbf16>
    tpu.vector_store %arg8[%c48, %c0_36], %40 {strides = array<i32>} : memref<248x128xbf16, #tpu.memory_space<vmem>>, vector<8x128xbf16>,
    %c0_37 = arith.constant 0 : index
    %c7 = arith.constant 7 : index
    %42 = vector.load %arg6[%c0_37, %c7] : memref<8x158xf32, #tpu.memory_space<vmem>>, vector<8x128xf32>
    %43 = arith.truncf %42 : vector<8x128xf32> to vector<8x128xbf16>
    %c56 = arith.constant 56 : index
    %c0_38 = arith.constant 0 : index
    %44 = vector.load %arg8[%c56, %c0_38] : memref<248x128xbf16, #tpu.memory_space<vmem>>, vector<8x128xbf16>
    tpu.vector_store %arg8[%c56, %c0_38], %43 {strides = array<i32>} : memref<248x128xbf16, #tpu.memory_space<vmem>>, vector<8x128xbf16>,
    %c0_39 = arith.constant 0 : index
    %c8_40 = arith.constant 8 : index
    %45 = vector.load %arg6[%c0_39, %c8_40] : memref<8x158xf32, #tpu.memory_space<vmem>>, vector<8x128xf32>
    %46 = arith.truncf %45 : vector<8x128xf32> to vector<8x128xbf16>
    %c64 = arith.constant 64 : index
    %c0_41 = arith.constant 0 : index
    %47 = vector.load %arg8[%c64, %c0_41] : memref<248x128xbf16, #tpu.memory_space<vmem>>, vector<8x128xbf16>
    tpu.vector_store %arg8[%c64, %c0_41], %46 {strides = array<i32>} : memref<248x128xbf16, #tpu.memory_space<vmem>>, vector<8x128xbf16>,
    %c0_42 = arith.constant 0 : index
    %c9 = arith.constant 9 : index
    %48 = vector.load %arg6[%c0_42, %c9] : memref<8x158xf32, #tpu.memory_space<vmem>>, vector<8x128xf32>
    %49 = arith.truncf %48 : vector<8x128xf32> to vector<8x128xbf16>
    %c72 = arith.constant 72 : index
    %c0_43 = arith.constant 0 : index
    %50 = vector.load %arg8[%c72, %c0_43] : memref<248x128xbf16, #tpu.memory_space<vmem>>, vector<8x128xbf16>
    tpu.vector_store %arg8[%c72, %c0_43], %49 {strides = array<i32>} : memref<248x128xbf16, #tpu.memory_space<vmem>>, vector<8x128xbf16>,
    %c0_44 = arith.constant 0 : index
    %c10 = arith.constant 10 : index
    %51 = vector.load %arg6[%c0_44, %c10] : memref<8x158xf32, #tpu.memory_space<vmem>>, vector<8x128xf32>
    %52 = arith.truncf %51 : vector<8x128xf32> to vector<8x128xbf16>
    %c80 = arith.constant 80 : index
    %c0_45 = arith.constant 0 : index
    %53 = vector.load %arg8[%c80, %c0_45] : memref<248x128xbf16, #tpu.memory_space<vmem>>, vector<8x128xbf16>
    tpu.vector_store %arg8[%c80, %c0_45], %52 {strides = array<i32>} : memref<248x128xbf16, #tpu.memory_space<vmem>>, vector<8x128xbf16>,
    %c0_46 = arith.constant 0 : index
    %c11 = arith.constant 11 : index
    %54 = vector.load %arg6[%c0_46, %c11] : memref<8x158xf32, #tpu.memory_space<vmem>>, vector<8x128xf32>
    %55 = arith.truncf %54 : vector<8x128xf32> to vector<8x128xbf16>
    %c88 = arith.constant 88 : index
    %c0_47 = arith.constant 0 : index
    %56 = vector.load %arg8[%c88, %c0_47] : memref<248x128xbf16, #tpu.memory_space<vmem>>, vector<8x128xbf16>
    tpu.vector_store %arg8[%c88, %c0_47], %55 {strides = array<i32>} : memref<248x128xbf16, #tpu.memory_space<vmem>>, vector<8x128xbf16>,
    %c0_48 = arith.constant 0 : index
    %c12 = arith.constant 12 : index
    %57 = vector.load %arg6[%c0_48, %c12] : memref<8x158xf32, #tpu.memory_space<vmem>>, vector<8x128xf32>
    %58 = arith.truncf %57 : vector<8x128xf32> to vector<8x128xbf16>
    %c96 = arith.constant 96 : index
    %c0_49 = arith.constant 0 : index
    %59 = vector.load %arg8[%c96, %c0_49] : memref<248x128xbf16, #tpu.memory_space<vmem>>, vector<8x128xbf16>
    tpu.vector_store %arg8[%c96, %c0_49], %58 {strides = array<i32>} : memref<248x128xbf16, #tpu.memory_space<vmem>>, vector<8x128xbf16>,
    %c0_50 = arith.constant 0 : index
    %c13 = arith.constant 13 : index
    %60 = vector.load %arg6[%c0_50, %c13] : memref<8x158xf32, #tpu.memory_space<vmem>>, vector<8x128xf32>
    %61 = arith.truncf %60 : vector<8x128xf32> to vector<8x128xbf16>
    %c104 = arith.constant 104 : index
    %c0_51 = arith.constant 0 : index
    %62 = vector.load %arg8[%c104, %c0_51] : memref<248x128xbf16, #tpu.memory_space<vmem>>, vector<8x128xbf16>
    tpu.vector_store %arg8[%c104, %c0_51], %61 {strides = array<i32>} : memref<248x128xbf16, #tpu.memory_space<vmem>>, vector<8x128xbf16>,
    %c0_52 = arith.constant 0 : index
    %c14 = arith.constant 14 : index
    %63 = vector.load %arg6[%c0_52, %c14] : memref<8x158xf32, #tpu.memory_space<vmem>>, vector<8x128xf32>
    %64 = arith.truncf %63 : vector<8x128xf32> to vector<8x128xbf16>
    %c112 = arith.constant 112 : index
    %c0_53 = arith.constant 0 : index
    %65 = vector.load %arg8[%c112, %c0_53] : memref<248x128xbf16, #tpu.memory_space<vmem>>, vector<8x128xbf16>
    tpu.vector_store %arg8[%c112, %c0_53], %64 {strides = array<i32>} : memref<248x128xbf16, #tpu.memory_space<vmem>>, vector<8x128xbf16>,
    %c0_54 = arith.constant 0 : index
    %c15_55 = arith.constant 15 : index
    %66 = vector.load %arg6[%c0_54, %c15_55] : memref<8x158xf32, #tpu.memory_space<vmem>>, vector<8x128xf32>
    %67 = arith.truncf %66 : vector<8x128xf32> to vector<8x128xbf16>
    %c120 = arith.constant 120 : index
    %c0_56 = arith.constant 0 : index
    %68 = vector.load %arg8[%c120, %c0_56] : memref<248x128xbf16, #tpu.memory_space<vmem>>, vector<8x128xbf16>
    tpu.vector_store %arg8[%c120, %c0_56], %67 {strides = array<i32>} : memref<248x128xbf16, #tpu.memory_space<vmem>>, vector<8x128xbf16>,
    %c0_57 = arith.constant 0 : index
    %c16_58 = arith.constant 16 : index
    %69 = vector.load %arg6[%c0_57, %c16_58] : memref<8x158xf32, #tpu.memory_space<vmem>>, vector<8x128xf32>
    %70 = arith.truncf %69 : vector<8x128xf32> to vector<8x128xbf16>
    %c128 = arith.constant 128 : index
    %c0_59 = arith.constant 0 : index
    %71 = vector.load %arg8[%c128, %c0_59] : memref<248x128xbf16, #tpu.memory_space<vmem>>, vector<8x128xbf16>
    tpu.vector_store %arg8[%c128, %c0_59], %70 {strides = array<i32>} : memref<248x128xbf16, #tpu.memory_space<vmem>>, vector<8x128xbf16>,
    %c0_60 = arith.constant 0 : index
    %c17 = arith.constant 17 : index
    %72 = vector.load %arg6[%c0_60, %c17] : memref<8x158xf32, #tpu.memory_space<vmem>>, vector<8x128xf32>
    %73 = arith.truncf %72 : vector<8x128xf32> to vector<8x128xbf16>
    %c136 = arith.constant 136 : index
    %c0_61 = arith.constant 0 : index
    %74 = vector.load %arg8[%c136, %c0_61] : memref<248x128xbf16, #tpu.memory_space<vmem>>, vector<8x128xbf16>
    tpu.vector_store %arg8[%c136, %c0_61], %73 {strides = array<i32>} : memref<248x128xbf16, #tpu.memory_space<vmem>>, vector<8x128xbf16>,
    %c0_62 = arith.constant 0 : index
    %c18 = arith.constant 18 : index
    %75 = vector.load %arg6[%c0_62, %c18] : memref<8x158xf32, #tpu.memory_space<vmem>>, vector<8x128xf32>
    %76 = arith.truncf %75 : vector<8x128xf32> to vector<8x128xbf16>
    %c144 = arith.constant 144 : index
    %c0_63 = arith.constant 0 : index
    %77 = vector.load %arg8[%c144, %c0_63] : memref<248x128xbf16, #tpu.memory_space<vmem>>, vector<8x128xbf16>
    tpu.vector_store %arg8[%c144, %c0_63], %76 {strides = array<i32>} : memref<248x128xbf16, #tpu.memory_space<vmem>>, vector<8x128xbf16>,
    %c0_64 = arith.constant 0 : index
    %c19 = arith.constant 19 : index
    %78 = vector.load %arg6[%c0_64, %c19] : memref<8x158xf32, #tpu.memory_space<vmem>>, vector<8x128xf32>
    %79 = arith.truncf %78 : vector<8x128xf32> to vector<8x128xbf16>
    %c152 = arith.constant 152 : index
    %c0_65 = arith.constant 0 : index
    %80 = vector.load %arg8[%c152, %c0_65] : memref<248x128xbf16, #tpu.memory_space<vmem>>, vector<8x128xbf16>
    tpu.vector_store %arg8[%c152, %c0_65], %79 {strides = array<i32>} : memref<248x128xbf16, #tpu.memory_space<vmem>>, vector<8x128xbf16>,
    %c0_66 = arith.constant 0 : index
    %c20 = arith.constant 20 : index
    %81 = vector.load %arg6[%c0_66, %c20] : memref<8x158xf32, #tpu.memory_space<vmem>>, vector<8x128xf32>
    %82 = arith.truncf %81 : vector<8x128xf32> to vector<8x128xbf16>
    %c160 = arith.constant 160 : index
    %c0_67 = arith.constant 0 : index
    %83 = vector.load %arg8[%c160, %c0_67] : memref<248x128xbf16, #tpu.memory_space<vmem>>, vector<8x128xbf16>
    tpu.vector_store %arg8[%c160, %c0_67], %82 {strides = array<i32>} : memref<248x128xbf16, #tpu.memory_space<vmem>>, vector<8x128xbf16>,
    %c0_68 = arith.constant 0 : index
    %c21 = arith.constant 21 : index
    %84 = vector.load %arg6[%c0_68, %c21] : memref<8x158xf32, #tpu.memory_space<vmem>>, vector<8x128xf32>
    %85 = arith.truncf %84 : vector<8x128xf32> to vector<8x128xbf16>
    %c168 = arith.constant 168 : index
    %c0_69 = arith.constant 0 : index
    %86 = vector.load %arg8[%c168, %c0_69] : memref<248x128xbf16, #tpu.memory_space<vmem>>, vector<8x128xbf16>
    tpu.vector_store %arg8[%c168, %c0_69], %85 {strides = array<i32>} : memref<248x128xbf16, #tpu.memory_space<vmem>>, vector<8x128xbf16>,
    %c0_70 = arith.constant 0 : index
    %c22 = arith.constant 22 : index
    %87 = vector.load %arg6[%c0_70, %c22] : memref<8x158xf32, #tpu.memory_space<vmem>>, vector<8x128xf32>
    %88 = arith.truncf %87 : vector<8x128xf32> to vector<8x128xbf16>
    %c176 = arith.constant 176 : index
    %c0_71 = arith.constant 0 : index
    %89 = vector.load %arg8[%c176, %c0_71] : memref<248x128xbf16, #tpu.memory_space<vmem>>, vector<8x128xbf16>
    tpu.vector_store %arg8[%c176, %c0_71], %88 {strides = array<i32>} : memref<248x128xbf16, #tpu.memory_space<vmem>>, vector<8x128xbf16>,
    %c0_72 = arith.constant 0 : index
    %c23 = arith.constant 23 : index
    %90 = vector.load %arg6[%c0_72, %c23] : memref<8x158xf32, #tpu.memory_space<vmem>>, vector<8x128xf32>
    %91 = arith.truncf %90 : vector<8x128xf32> to vector<8x128xbf16>
    %c184 = arith.constant 184 : index
    %c0_73 = arith.constant 0 : index
    %92 = vector.load %arg8[%c184, %c0_73] : memref<248x128xbf16, #tpu.memory_space<vmem>>, vector<8x128xbf16>
    tpu.vector_store %arg8[%c184, %c0_73], %91 {strides = array<i32>} : memref<248x128xbf16, #tpu.memory_space<vmem>>, vector<8x128xbf16>,
    %c0_74 = arith.constant 0 : index
    %c24_75 = arith.constant 24 : index
    %93 = vector.load %arg6[%c0_74, %c24_75] : memref<8x158xf32, #tpu.memory_space<vmem>>, vector<8x128xf32>
    %94 = arith.truncf %93 : vector<8x128xf32> to vector<8x128xbf16>
    %c192 = arith.constant 192 : index
    %c0_76 = arith.constant 0 : index
    %95 = vector.load %arg8[%c192, %c0_76] : memref<248x128xbf16, #tpu.memory_space<vmem>>, vector<8x128xbf16>
    tpu.vector_store %arg8[%c192, %c0_76], %94 {strides = array<i32>} : memref<248x128xbf16, #tpu.memory_space<vmem>>, vector<8x128xbf16>,
    %c0_77 = arith.constant 0 : index
    %c25 = arith.constant 25 : index
    %96 = vector.load %arg6[%c0_77, %c25] : memref<8x158xf32, #tpu.memory_space<vmem>>, vector<8x128xf32>
    %97 = arith.truncf %96 : vector<8x128xf32> to vector<8x128xbf16>
    %c200 = arith.constant 200 : index
    %c0_78 = arith.constant 0 : index
    %98 = vector.load %arg8[%c200, %c0_78] : memref<248x128xbf16, #tpu.memory_space<vmem>>, vector<8x128xbf16>
    tpu.vector_store %arg8[%c200, %c0_78], %97 {strides = array<i32>} : memref<248x128xbf16, #tpu.memory_space<vmem>>, vector<8x128xbf16>,
    %c0_79 = arith.constant 0 : index
    %c26 = arith.constant 26 : index
    %99 = vector.load %arg6[%c0_79, %c26] : memref<8x158xf32, #tpu.memory_space<vmem>>, vector<8x128xf32>
    %100 = arith.truncf %99 : vector<8x128xf32> to vector<8x128xbf16>
    %c208 = arith.constant 208 : index
    %c0_80 = arith.constant 0 : index
    %101 = vector.load %arg8[%c208, %c0_80] : memref<248x128xbf16, #tpu.memory_space<vmem>>, vector<8x128xbf16>
    tpu.vector_store %arg8[%c208, %c0_80], %100 {strides = array<i32>} : memref<248x128xbf16, #tpu.memory_space<vmem>>, vector<8x128xbf16>,
    %c0_81 = arith.constant 0 : index
    %c27 = arith.constant 27 : index
    %102 = vector.load %arg6[%c0_81, %c27] : memref<8x158xf32, #tpu.memory_space<vmem>>, vector<8x128xf32>
    %103 = arith.truncf %102 : vector<8x128xf32> to vector<8x128xbf16>
    %c216 = arith.constant 216 : index
    %c0_82 = arith.constant 0 : index
    %104 = vector.load %arg8[%c216, %c0_82] : memref<248x128xbf16, #tpu.memory_space<vmem>>, vector<8x128xbf16>
    tpu.vector_store %arg8[%c216, %c0_82], %103 {strides = array<i32>} : memref<248x128xbf16, #tpu.memory_space<vmem>>, vector<8x128xbf16>,
    %c0_83 = arith.constant 0 : index
    %c28 = arith.constant 28 : index
    %105 = vector.load %arg6[%c0_83, %c28] : memref<8x158xf32, #tpu.memory_space<vmem>>, vector<8x128xf32>
    %106 = arith.truncf %105 : vector<8x128xf32> to vector<8x128xbf16>
    %c224 = arith.constant 224 : index
    %c0_84 = arith.constant 0 : index
    %107 = vector.load %arg8[%c224, %c0_84] : memref<248x128xbf16, #tpu.memory_space<vmem>>, vector<8x128xbf16>
    tpu.vector_store %arg8[%c224, %c0_84], %106 {strides = array<i32>} : memref<248x128xbf16, #tpu.memory_space<vmem>>, vector<8x128xbf16>,
    %c0_85 = arith.constant 0 : index
    %c29 = arith.constant 29 : index
    %108 = vector.load %arg6[%c0_85, %c29] : memref<8x158xf32, #tpu.memory_space<vmem>>, vector<8x128xf32>
    %109 = arith.truncf %108 : vector<8x128xf32> to vector<8x128xbf16>
    %c232 = arith.constant 232 : index
    %c0_86 = arith.constant 0 : index
    %110 = vector.load %arg8[%c232, %c0_86] : memref<248x128xbf16, #tpu.memory_space<vmem>>, vector<8x128xbf16>
    tpu.vector_store %arg8[%c232, %c0_86], %109 {strides = array<i32>} : memref<248x128xbf16, #tpu.memory_space<vmem>>, vector<8x128xbf16>,
    %c0_87 = arith.constant 0 : index
    %c30 = arith.constant 30 : index
    %111 = vector.load %arg6[%c0_87, %c30] : memref<8x158xf32, #tpu.memory_space<vmem>>, vector<8x128xf32>
    %112 = arith.truncf %111 : vector<8x128xf32> to vector<8x128xbf16>
    %c240 = arith.constant 240 : index
    %c0_88 = arith.constant 0 : index
    %113 = vector.load %arg8[%c240, %c0_88] : memref<248x128xbf16, #tpu.memory_space<vmem>>, vector<8x128xbf16>
    tpu.vector_store %arg8[%c240, %c0_88], %112 {strides = array<i32>} : memref<248x128xbf16, #tpu.memory_space<vmem>>, vector<8x128xbf16>,
    %c0_89 = arith.constant 0 : index
    %c0_90 = arith.constant 0 : index
    %c0_91 = arith.constant 0 : index
    %114 = vector.load %arg2[%c0_89, %c0_90, %c0_91] : memref<1x8x248xbf16, #tpu.memory_space<vmem>>, vector<1x8x248xbf16>
    %115 = vector.shape_cast %114 : vector<1x8x248xbf16> to vector<8x248xbf16>
    %c0_92 = arith.constant 0 : index
    %c0_93 = arith.constant 0 : index
    %116 = vector.load %arg8[%c0_92, %c0_93] : memref<248x128xbf16, #tpu.memory_space<vmem>>, vector<248x128xbf16>
    %cst_94 = arith.constant dense<0.000000e+00> : vector<8x128xf32>
    %117 = tpu.matmul %115, %116, %cst_94 {dimension_numbers = #tpu.dot_dimension_numbers<[1], [0], [0], [1], [0, 0, 1, 1], [], []>} : vector<8x248xbf16>, vector<248x128xbf16>, vector<8x128xf32> -> vector<8x128xf32>
    %118 = arith.addf %20, %117 : vector<8x128xf32>
    %119 = vector.broadcast %11 : vector<1x128xf32> to vector<8x128xf32>
    %120 = arith.mulf %118, %119 : vector<8x128xf32>
    %cst_95 = arith.constant dense<0.000000e+00> : vector<8xf32>
    %121 = vector.multi_reduction <add>, %120, %cst_95 [1] : vector<8x128xf32> to vector<8xf32>
    %122 = vector.shape_cast %121 : vector<8xf32> to vector<8x1xf32>
    %123 = arith.mulf %120, %118 : vector<8x128xf32>
    %cst_96 = arith.constant dense<0.000000e+00> : vector<8xf32>
    %124 = vector.multi_reduction <add>, %123, %cst_96 [1] : vector<8x128xf32> to vector<8xf32>
    %125 = vector.shape_cast %124 : vector<8xf32> to vector<8x1xf32>
    %cst_97 = arith.constant 6.250000e-02 : f32
    %126 = vector.broadcast %cst_97 : f32 to vector<8x1xf32>
    %127 = arith.mulf %122, %126 : vector<8x1xf32>
    %cst_98 = arith.constant 6.250000e-02 : f32
    %128 = vector.broadcast %cst_98 : f32 to vector<8x1xf32>
    %129 = arith.mulf %125, %128 : vector<8x1xf32>
    %130 = arith.mulf %127, %127 : vector<8x1xf32>
    %131 = arith.subf %129, %130 : vector<8x1xf32>
    %cst_99 = arith.constant 0.000000e+00 : f32
    %132 = vector.broadcast %cst_99 : f32 to vector<8x1xf32>
    %133 = arith.maximumf %131, %132 : vector<8x1xf32>
    %cst_100 = arith.constant 9.99999974E-6 : f32
    %134 = vector.broadcast %cst_100 : f32 to vector<8x1xf32>
    %135 = arith.addf %133, %134 : vector<8x1xf32>
    %136 = math.rsqrt %135 : vector<8x1xf32>
    %137 = arith.mulf %13, %136 : vector<8x1xf32>
    %138 = arith.mulf %137, %127 : vector<8x1xf32>
    %139 = arith.subf %15, %138 : vector<8x1xf32>
    %140 = vector.broadcast %137 : vector<8x1xf32> to vector<8x128xf32>
    %141 = arith.mulf %118, %140 : vector<8x128xf32>
    %142 = vector.broadcast %139 : vector<8x1xf32> to vector<8x128xf32>
    %143 = arith.addf %141, %142 : vector<8x128xf32>
    %cst_101 = arith.constant 0.000000e+00 : f32
    %144 = vector.broadcast %cst_101 : f32 to vector<8x128xf32>
    %145 = arith.maximumf %143, %144 : vector<8x128xf32>
    %146 = vector.broadcast %11 : vector<1x128xf32> to vector<8x128xf32>
    %147 = arith.mulf %145, %146 : vector<8x128xf32>
    %148 = arith.truncf %147 : vector<8x128xf32> to vector<8x128xbf16>
    %c0_102 = arith.constant 0 : index
    %c15_103 = arith.constant 15 : index
    %149 = vector.load %arg7[%c0_102, %c15_103] : memref<8x158xbf16, #tpu.memory_space<vmem>>, vector<8x128xbf16>
    tpu.vector_store %arg7[%c0_102, %c15_103], %148 {strides = array<i32>} : memref<8x158xbf16, #tpu.memory_space<vmem>>, vector<8x128xbf16>,
    %cst_104 = arith.constant 0.000000e+00 : f32
    %150 = vector.broadcast %cst_104 : f32 to vector<8x128xf32>
    %c0_105 = arith.constant 0 : index
    %c0_106 = arith.constant 0 : index
    %151 = vector.load %arg7[%c0_105, %c0_106] : memref<8x158xbf16, #tpu.memory_space<vmem>>, vector<8x128xbf16>
    %c0_107 = arith.constant 0 : index
    %c0_108 = arith.constant 0 : index
    %152 = vector.load %arg8[%c0_107, %c0_108] : memref<248x128xbf16, #tpu.memory_space<vmem>>, vector<8x128xbf16>
    tpu.vector_store %arg8[%c0_107, %c0_108], %151 {strides = array<i32>} : memref<248x128xbf16, #tpu.memory_space<vmem>>, vector<8x128xbf16>,
    %c0_109 = arith.constant 0 : index
    %c1_110 = arith.constant 1 : index
    %153 = vector.load %arg7[%c0_109, %c1_110] : memref<8x158xbf16, #tpu.memory_space<vmem>>, vector<8x128xbf16>
    %c8_111 = arith.constant 8 : index
    %c0_112 = arith.constant 0 : index
    %154 = vector.load %arg8[%c8_111, %c0_112] : memref<248x128xbf16, #tpu.memory_space<vmem>>, vector<8x128xbf16>
    tpu.vector_store %arg8[%c8_111, %c0_112], %153 {strides = array<i32>} : memref<248x128xbf16, #tpu.memory_space<vmem>>, vector<8x128xbf16>,
    %c0_113 = arith.constant 0 : index
    %c2_114 = arith.constant 2 : index
    %155 = vector.load %arg7[%c0_113, %c2_114] : memref<8x158xbf16, #tpu.memory_space<vmem>>, vector<8x128xbf16>
    %c16_115 = arith.constant 16 : index
    %c0_116 = arith.constant 0 : index
    %156 = vector.load %arg8[%c16_115, %c0_116] : memref<248x128xbf16, #tpu.memory_space<vmem>>, vector<8x128xbf16>
    tpu.vector_store %arg8[%c16_115, %c0_116], %155 {strides = array<i32>} : memref<248x128xbf16, #tpu.memory_space<vmem>>, vector<8x128xbf16>,
    %c0_117 = arith.constant 0 : index
    %c3_118 = arith.constant 3 : index
    %157 = vector.load %arg7[%c0_117, %c3_118] : memref<8x158xbf16, #tpu.memory_space<vmem>>, vector<8x128xbf16>
    %c24_119 = arith.constant 24 : index
    %c0_120 = arith.constant 0 : index
    %158 = vector.load %arg8[%c24_119, %c0_120] : memref<248x128xbf16, #tpu.memory_space<vmem>>, vector<8x128xbf16>
    tpu.vector_store %arg8[%c24_119, %c0_120], %157 {strides = array<i32>} : memref<248x128xbf16, #tpu.memory_space<vmem>>, vector<8x128xbf16>,
    %c0_121 = arith.constant 0 : index
    %c4_122 = arith.constant 4 : index
    %159 = vector.load %arg7[%c0_121, %c4_122] : memref<8x158xbf16, #tpu.memory_space<vmem>>, vector<8x128xbf16>
    %c32_123 = arith.constant 32 : index
    %c0_124 = arith.constant 0 : index
    %160 = vector.load %arg8[%c32_123, %c0_124] : memref<248x128xbf16, #tpu.memory_space<vmem>>, vector<8x128xbf16>
    tpu.vector_store %arg8[%c32_123, %c0_124], %159 {strides = array<i32>} : memref<248x128xbf16, #tpu.memory_space<vmem>>, vector<8x128xbf16>,
    %c0_125 = arith.constant 0 : index
    %c5_126 = arith.constant 5 : index
    %161 = vector.load %arg7[%c0_125, %c5_126] : memref<8x158xbf16, #tpu.memory_space<vmem>>, vector<8x128xbf16>
    %c40_127 = arith.constant 40 : index
    %c0_128 = arith.constant 0 : index
    %162 = vector.load %arg8[%c40_127, %c0_128] : memref<248x128xbf16, #tpu.memory_space<vmem>>, vector<8x128xbf16>
    tpu.vector_store %arg8[%c40_127, %c0_128], %161 {strides = array<i32>} : memref<248x128xbf16, #tpu.memory_space<vmem>>, vector<8x128xbf16>,
    %c0_129 = arith.constant 0 : index
    %c6_130 = arith.constant 6 : index
    %163 = vector.load %arg7[%c0_129, %c6_130] : memref<8x158xbf16, #tpu.memory_space<vmem>>, vector<8x128xbf16>
    %c48_131 = arith.constant 48 : index
    %c0_132 = arith.constant 0 : index
    %164 = vector.load %arg8[%c48_131, %c0_132] : memref<248x128xbf16, #tpu.memory_space<vmem>>, vector<8x128xbf16>
    tpu.vector_store %arg8[%c48_131, %c0_132], %163 {strides = array<i32>} : memref<248x128xbf16, #tpu.memory_space<vmem>>, vector<8x128xbf16>,
    %c0_133 = arith.constant 0 : index
    %c7_134 = arith.constant 7 : index
    %165 = vector.load %arg7[%c0_133, %c7_134] : memref<8x158xbf16, #tpu.memory_space<vmem>>, vector<8x128xbf16>
    %c56_135 = arith.constant 56 : index
    %c0_136 = arith.constant 0 : index
    %166 = vector.load %arg8[%c56_135, %c0_136] : memref<248x128xbf16, #tpu.memory_space<vmem>>, vector<8x128xbf16>
    tpu.vector_store %arg8[%c56_135, %c0_136], %165 {strides = array<i32>} : memref<248x128xbf16, #tpu.memory_space<vmem>>, vector<8x128xbf16>,
    %c0_137 = arith.constant 0 : index
    %c8_138 = arith.constant 8 : index
    %167 = vector.load %arg7[%c0_137, %c8_138] : memref<8x158xbf16, #tpu.memory_space<vmem>>, vector<8x128xbf16>
    %c64_139 = arith.constant 64 : index
    %c0_140 = arith.constant 0 : index
    %168 = vector.load %arg8[%c64_139, %c0_140] : memref<248x128xbf16, #tpu.memory_space<vmem>>, vector<8x128xbf16>
    tpu.vector_store %arg8[%c64_139, %c0_140], %167 {strides = array<i32>} : memref<248x128xbf16, #tpu.memory_space<vmem>>, vector<8x128xbf16>,
    %c0_141 = arith.constant 0 : index
    %c9_142 = arith.constant 9 : index
    %169 = vector.load %arg7[%c0_141, %c9_142] : memref<8x158xbf16, #tpu.memory_space<vmem>>, vector<8x128xbf16>
    %c72_143 = arith.constant 72 : index
    %c0_144 = arith.constant 0 : index
    %170 = vector.load %arg8[%c72_143, %c0_144] : memref<248x128xbf16, #tpu.memory_space<vmem>>, vector<8x128xbf16>
    tpu.vector_store %arg8[%c72_143, %c0_144], %169 {strides = array<i32>} : memref<248x128xbf16, #tpu.memory_space<vmem>>, vector<8x128xbf16>,
    %c0_145 = arith.constant 0 : index
    %c10_146 = arith.constant 10 : index
    %171 = vector.load %arg7[%c0_145, %c10_146] : memref<8x158xbf16, #tpu.memory_space<vmem>>, vector<8x128xbf16>
    %c80_147 = arith.constant 80 : index
    %c0_148 = arith.constant 0 : index
    %172 = vector.load %arg8[%c80_147, %c0_148] : memref<248x128xbf16, #tpu.memory_space<vmem>>, vector<8x128xbf16>
    tpu.vector_store %arg8[%c80_147, %c0_148], %171 {strides = array<i32>} : memref<248x128xbf16, #tpu.memory_space<vmem>>, vector<8x128xbf16>,
    %c0_149 = arith.constant 0 : index
    %c11_150 = arith.constant 11 : index
    %173 = vector.load %arg7[%c0_149, %c11_150] : memref<8x158xbf16, #tpu.memory_space<vmem>>, vector<8x128xbf16>
    %c88_151 = arith.constant 88 : index
    %c0_152 = arith.constant 0 : index
    %174 = vector.load %arg8[%c88_151, %c0_152] : memref<248x128xbf16, #tpu.memory_space<vmem>>, vector<8x128xbf16>
    tpu.vector_store %arg8[%c88_151, %c0_152], %173 {strides = array<i32>} : memref<248x128xbf16, #tpu.memory_space<vmem>>, vector<8x128xbf16>,
    %c0_153 = arith.constant 0 : index
    %c12_154 = arith.constant 12 : index
    %175 = vector.load %arg7[%c0_153, %c12_154] : memref<8x158xbf16, #tpu.memory_space<vmem>>, vector<8x128xbf16>
    %c96_155 = arith.constant 96 : index
    %c0_156 = arith.constant 0 : index
    %176 = vector.load %arg8[%c96_155, %c0_156] : memref<248x128xbf16, #tpu.memory_space<vmem>>, vector<8x128xbf16>
    tpu.vector_store %arg8[%c96_155, %c0_156], %175 {strides = array<i32>} : memref<248x128xbf16, #tpu.memory_space<vmem>>, vector<8x128xbf16>,
    %c0_157 = arith.constant 0 : index
    %c13_158 = arith.constant 13 : index
    %177 = vector.load %arg7[%c0_157, %c13_158] : memref<8x158xbf16, #tpu.memory_space<vmem>>, vector<8x128xbf16>
    %c104_159 = arith.constant 104 : index
    %c0_160 = arith.constant 0 : index
    %178 = vector.load %arg8[%c104_159, %c0_160] : memref<248x128xbf16, #tpu.memory_space<vmem>>, vector<8x128xbf16>
    tpu.vector_store %arg8[%c104_159, %c0_160], %177 {strides = array<i32>} : memref<248x128xbf16, #tpu.memory_space<vmem>>, vector<8x128xbf16>,
    %c0_161 = arith.constant 0 : index
    %c14_162 = arith.constant 14 : index
    %179 = vector.load %arg7[%c0_161, %c14_162] : memref<8x158xbf16, #tpu.memory_space<vmem>>, vector<8x128xbf16>
    %c112_163 = arith.constant 112 : index
    %c0_164 = arith.constant 0 : index
    %180 = vector.load %arg8[%c112_163, %c0_164] : memref<248x128xbf16, #tpu.memory_space<vmem>>, vector<8x128xbf16>
    tpu.vector_store %arg8[%c112_163, %c0_164], %179 {strides = array<i32>} : memref<248x128xbf16, #tpu.memory_space<vmem>>, vector<8x128xbf16>,
    %c0_165 = arith.constant 0 : index
    %c15_166 = arith.constant 15 : index
    %181 = vector.load %arg7[%c0_165, %c15_166] : memref<8x158xbf16, #tpu.memory_space<vmem>>, vector<8x128xbf16>
    %c120_167 = arith.constant 120 : index
    %c0_168 = arith.constant 0 : index
    %182 = vector.load %arg8[%c120_167, %c0_168] : memref<248x128xbf16, #tpu.memory_space<vmem>>, vector<8x128xbf16>
    tpu.vector_store %arg8[%c120_167, %c0_168], %181 {strides = array<i32>} : memref<248x128xbf16, #tpu.memory_space<vmem>>, vector<8x128xbf16>,
    %c0_169 = arith.constant 0 : index
    %c16_170 = arith.constant 16 : index
    %183 = vector.load %arg7[%c0_169, %c16_170] : memref<8x158xbf16, #tpu.memory_space<vmem>>, vector<8x128xbf16>
    %c128_171 = arith.constant 128 : index
    %c0_172 = arith.constant 0 : index
    %184 = vector.load %arg8[%c128_171, %c0_172] : memref<248x128xbf16, #tpu.memory_space<vmem>>, vector<8x128xbf16>
    tpu.vector_store %arg8[%c128_171, %c0_172], %183 {strides = array<i32>} : memref<248x128xbf16, #tpu.memory_space<vmem>>, vector<8x128xbf16>,
    %c0_173 = arith.constant 0 : index
    %c17_174 = arith.constant 17 : index
    %185 = vector.load %arg7[%c0_173, %c17_174] : memref<8x158xbf16, #tpu.memory_space<vmem>>, vector<8x128xbf16>
    %c136_175 = arith.constant 136 : index
    %c0_176 = arith.constant 0 : index
    %186 = vector.load %arg8[%c136_175, %c0_176] : memref<248x128xbf16, #tpu.memory_space<vmem>>, vector<8x128xbf16>
    tpu.vector_store %arg8[%c136_175, %c0_176], %185 {strides = array<i32>} : memref<248x128xbf16, #tpu.memory_space<vmem>>, vector<8x128xbf16>,
    %c0_177 = arith.constant 0 : index
    %c18_178 = arith.constant 18 : index
    %187 = vector.load %arg7[%c0_177, %c18_178] : memref<8x158xbf16, #tpu.memory_space<vmem>>, vector<8x128xbf16>
    %c144_179 = arith.constant 144 : index
    %c0_180 = arith.constant 0 : index
    %188 = vector.load %arg8[%c144_179, %c0_180] : memref<248x128xbf16, #tpu.memory_space<vmem>>, vector<8x128xbf16>
    tpu.vector_store %arg8[%c144_179, %c0_180], %187 {strides = array<i32>} : memref<248x128xbf16, #tpu.memory_space<vmem>>, vector<8x128xbf16>,
    %c0_181 = arith.constant 0 : index
    %c19_182 = arith.constant 19 : index
    %189 = vector.load %arg7[%c0_181, %c19_182] : memref<8x158xbf16, #tpu.memory_space<vmem>>, vector<8x128xbf16>
    %c152_183 = arith.constant 152 : index
    %c0_184 = arith.constant 0 : index
    %190 = vector.load %arg8[%c152_183, %c0_184] : memref<248x128xbf16, #tpu.memory_space<vmem>>, vector<8x128xbf16>
    tpu.vector_store %arg8[%c152_183, %c0_184], %189 {strides = array<i32>} : memref<248x128xbf16, #tpu.memory_space<vmem>>, vector<8x128xbf16>,
    %c0_185 = arith.constant 0 : index
    %c20_186 = arith.constant 20 : index
    %191 = vector.load %arg7[%c0_185, %c20_186] : memref<8x158xbf16, #tpu.memory_space<vmem>>, vector<8x128xbf16>
    %c160_187 = arith.constant 160 : index
    %c0_188 = arith.constant 0 : index
    %192 = vector.load %arg8[%c160_187, %c0_188] : memref<248x128xbf16, #tpu.memory_space<vmem>>, vector<8x128xbf16>
    tpu.vector_store %arg8[%c160_187, %c0_188], %191 {strides = array<i32>} : memref<248x128xbf16, #tpu.memory_space<vmem>>, vector<8x128xbf16>,
    %c0_189 = arith.constant 0 : index
    %c21_190 = arith.constant 21 : index
    %193 = vector.load %arg7[%c0_189, %c21_190] : memref<8x158xbf16, #tpu.memory_space<vmem>>, vector<8x128xbf16>
    %c168_191 = arith.constant 168 : index
    %c0_192 = arith.constant 0 : index
    %194 = vector.load %arg8[%c168_191, %c0_192] : memref<248x128xbf16, #tpu.memory_space<vmem>>, vector<8x128xbf16>
    tpu.vector_store %arg8[%c168_191, %c0_192], %193 {strides = array<i32>} : memref<248x128xbf16, #tpu.memory_space<vmem>>, vector<8x128xbf16>,
    %c0_193 = arith.constant 0 : index
    %c22_194 = arith.constant 22 : index
    %195 = vector.load %arg7[%c0_193, %c22_194] : memref<8x158xbf16, #tpu.memory_space<vmem>>, vector<8x128xbf16>
    %c176_195 = arith.constant 176 : index
    %c0_196 = arith.constant 0 : index
    %196 = vector.load %arg8[%c176_195, %c0_196] : memref<248x128xbf16, #tpu.memory_space<vmem>>, vector<8x128xbf16>
    tpu.vector_store %arg8[%c176_195, %c0_196], %195 {strides = array<i32>} : memref<248x128xbf16, #tpu.memory_space<vmem>>, vector<8x128xbf16>,
    %c0_197 = arith.constant 0 : index
    %c23_198 = arith.constant 23 : index
    %197 = vector.load %arg7[%c0_197, %c23_198] : memref<8x158xbf16, #tpu.memory_space<vmem>>, vector<8x128xbf16>
    %c184_199 = arith.constant 184 : index
    %c0_200 = arith.constant 0 : index
    %198 = vector.load %arg8[%c184_199, %c0_200] : memref<248x128xbf16, #tpu.memory_space<vmem>>, vector<8x128xbf16>
    tpu.vector_store %arg8[%c184_199, %c0_200], %197 {strides = array<i32>} : memref<248x128xbf16, #tpu.memory_space<vmem>>, vector<8x128xbf16>,
    %c0_201 = arith.constant 0 : index
    %c24_202 = arith.constant 24 : index
    %199 = vector.load %arg7[%c0_201, %c24_202] : memref<8x158xbf16, #tpu.memory_space<vmem>>, vector<8x128xbf16>
    %c192_203 = arith.constant 192 : index
    %c0_204 = arith.constant 0 : index
    %200 = vector.load %arg8[%c192_203, %c0_204] : memref<248x128xbf16, #tpu.memory_space<vmem>>, vector<8x128xbf16>
    tpu.vector_store %arg8[%c192_203, %c0_204], %199 {strides = array<i32>} : memref<248x128xbf16, #tpu.memory_space<vmem>>, vector<8x128xbf16>,
    %c0_205 = arith.constant 0 : index
    %c25_206 = arith.constant 25 : index
    %201 = vector.load %arg7[%c0_205, %c25_206] : memref<8x158xbf16, #tpu.memory_space<vmem>>, vector<8x128xbf16>
    %c200_207 = arith.constant 200 : index
    %c0_208 = arith.constant 0 : index
    %202 = vector.load %arg8[%c200_207, %c0_208] : memref<248x128xbf16, #tpu.memory_space<vmem>>, vector<8x128xbf16>
    tpu.vector_store %arg8[%c200_207, %c0_208], %201 {strides = array<i32>} : memref<248x128xbf16, #tpu.memory_space<vmem>>, vector<8x128xbf16>,
    %c0_209 = arith.constant 0 : index
    %c26_210 = arith.constant 26 : index
    %203 = vector.load %arg7[%c0_209, %c26_210] : memref<8x158xbf16, #tpu.memory_space<vmem>>, vector<8x128xbf16>
    %c208_211 = arith.constant 208 : index
    %c0_212 = arith.constant 0 : index
    %204 = vector.load %arg8[%c208_211, %c0_212] : memref<248x128xbf16, #tpu.memory_space<vmem>>, vector<8x128xbf16>
    tpu.vector_store %arg8[%c208_211, %c0_212], %203 {strides = array<i32>} : memref<248x128xbf16, #tpu.memory_space<vmem>>, vector<8x128xbf16>,
    %c0_213 = arith.constant 0 : index
    %c27_214 = arith.constant 27 : index
    %205 = vector.load %arg7[%c0_213, %c27_214] : memref<8x158xbf16, #tpu.memory_space<vmem>>, vector<8x128xbf16>
    %c216_215 = arith.constant 216 : index
    %c0_216 = arith.constant 0 : index
    %206 = vector.load %arg8[%c216_215, %c0_216] : memref<248x128xbf16, #tpu.memory_space<vmem>>, vector<8x128xbf16>
    tpu.vector_store %arg8[%c216_215, %c0_216], %205 {strides = array<i32>} : memref<248x128xbf16, #tpu.memory_space<vmem>>, vector<8x128xbf16>,
    %c0_217 = arith.constant 0 : index
    %c28_218 = arith.constant 28 : index
    %207 = vector.load %arg7[%c0_217, %c28_218] : memref<8x158xbf16, #tpu.memory_space<vmem>>, vector<8x128xbf16>
    %c224_219 = arith.constant 224 : index
    %c0_220 = arith.constant 0 : index
    %208 = vector.load %arg8[%c224_219, %c0_220] : memref<248x128xbf16, #tpu.memory_space<vmem>>, vector<8x128xbf16>
    tpu.vector_store %arg8[%c224_219, %c0_220], %207 {strides = array<i32>} : memref<248x128xbf16, #tpu.memory_space<vmem>>, vector<8x128xbf16>,
    %c0_221 = arith.constant 0 : index
    %c29_222 = arith.constant 29 : index
    %209 = vector.load %arg7[%c0_221, %c29_222] : memref<8x158xbf16, #tpu.memory_space<vmem>>, vector<8x128xbf16>
    %c232_223 = arith.constant 232 : index
    %c0_224 = arith.constant 0 : index
    %210 = vector.load %arg8[%c232_223, %c0_224] : memref<248x128xbf16, #tpu.memory_space<vmem>>, vector<8x128xbf16>
    tpu.vector_store %arg8[%c232_223, %c0_224], %209 {strides = array<i32>} : memref<248x128xbf16, #tpu.memory_space<vmem>>, vector<8x128xbf16>,
    %c0_225 = arith.constant 0 : index
    %c30_226 = arith.constant 30 : index
    %211 = vector.load %arg7[%c0_225, %c30_226] : memref<8x158xbf16, #tpu.memory_space<vmem>>, vector<8x128xbf16>
    %c240_227 = arith.constant 240 : index
    %c0_228 = arith.constant 0 : index
    %212 = vector.load %arg8[%c240_227, %c0_228] : memref<248x128xbf16, #tpu.memory_space<vmem>>, vector<8x128xbf16>
    tpu.vector_store %arg8[%c240_227, %c0_228], %211 {strides = array<i32>} : memref<248x128xbf16, #tpu.memory_space<vmem>>, vector<8x128xbf16>,
    %c0_229 = arith.constant 0 : index
    %c0_230 = arith.constant 0 : index
    %c0_231 = arith.constant 0 : index
    %213 = vector.load %arg3[%c0_229, %c0_230, %c0_231] : memref<1x8x248xbf16, #tpu.memory_space<vmem>>, vector<1x8x248xbf16>
    %214 = vector.shape_cast %213 : vector<1x8x248xbf16> to vector<8x248xbf16>
    %c0_232 = arith.constant 0 : index
    %c0_233 = arith.constant 0 : index
    %215 = vector.load %arg8[%c0_232, %c0_233] : memref<248x128xbf16, #tpu.memory_space<vmem>>, vector<248x128xbf16>
    %cst_234 = arith.constant dense<0.000000e+00> : vector<8x128xf32>
    %216 = tpu.matmul %214, %215, %cst_234 {dimension_numbers = #tpu.dot_dimension_numbers<[1], [0], [0], [1], [0, 0, 1, 1], [], []>} : vector<8x248xbf16>, vector<248x128xbf16>, vector<8x128xf32> -> vector<8x128xf32>
    %217 = arith.addf %150, %216 : vector<8x128xf32>
    %218 = vector.broadcast %11 : vector<1x128xf32> to vector<8x128xf32>
    %219 = arith.mulf %217, %218 : vector<8x128xf32>
    %cst_235 = arith.constant dense<0.000000e+00> : vector<8xf32>
    %220 = vector.multi_reduction <add>, %219, %cst_235 [1] : vector<8x128xf32> to vector<8xf32>
    %221 = vector.shape_cast %220 : vector<8xf32> to vector<8x1xf32>
    %222 = arith.mulf %219, %217 : vector<8x128xf32>
    %cst_236 = arith.constant dense<0.000000e+00> : vector<8xf32>
    %223 = vector.multi_reduction <add>, %222, %cst_236 [1] : vector<8x128xf32> to vector<8xf32>
    %224 = vector.shape_cast %223 : vector<8xf32> to vector<8x1xf32>
    %cst_237 = arith.constant 6.250000e-02 : f32
    %225 = vector.broadcast %cst_237 : f32 to vector<8x1xf32>
    %226 = arith.mulf %221, %225 : vector<8x1xf32>
    %cst_238 = arith.constant 6.250000e-02 : f32
    %227 = vector.broadcast %cst_238 : f32 to vector<8x1xf32>
    %228 = arith.mulf %224, %227 : vector<8x1xf32>
    %229 = arith.mulf %226, %226 : vector<8x1xf32>
    %230 = arith.subf %228, %229 : vector<8x1xf32>
    %cst_239 = arith.constant 0.000000e+00 : f32
    %231 = vector.broadcast %cst_239 : f32 to vector<8x1xf32>
    %232 = arith.maximumf %230, %231 : vector<8x1xf32>
    %cst_240 = arith.constant 9.99999974E-6 : f32
    %233 = vector.broadcast %cst_240 : f32 to vector<8x1xf32>
    %234 = arith.addf %232, %233 : vector<8x1xf32>
    %235 = math.rsqrt %234 : vector<8x1xf32>
    %236 = arith.mulf %17, %235 : vector<8x1xf32>
    %237 = arith.mulf %236, %226 : vector<8x1xf32>
    %238 = arith.subf %19, %237 : vector<8x1xf32>
    %239 = vector.broadcast %236 : vector<8x1xf32> to vector<8x128xf32>
    %240 = arith.mulf %217, %239 : vector<8x128xf32>
    %241 = vector.broadcast %238 : vector<8x1xf32> to vector<8x128xf32>
    %242 = arith.addf %240, %241 : vector<8x128xf32>
    %c0_241 = arith.constant 0 : index
    %c15_242 = arith.constant 15 : index
    %243 = vector.load %arg6[%c0_241, %c15_242] : memref<8x158xf32, #tpu.memory_space<vmem>>, vector<8x128xf32>
    %244 = arith.addf %242, %243 : vector<8x128xf32>
    %c0_243 = arith.constant 0 : index
    %c0_244 = arith.constant 0 : index
    %c0_245 = arith.constant 0 : index
    %245 = vector.load %arg5[%c0_243, %c0_244, %c0_245] : memref<1x8x128xf32, #tpu.memory_space<vmem>>, vector<1x8x128xf32>
    %246 = vector.shape_cast %245 : vector<1x8x128xf32> to vector<8x128xf32>
    %247 = vector.shape_cast %244 : vector<8x128xf32> to vector<1x8x128xf32>
    tpu.vector_store %arg5[%c0_243, %c0_244, %c0_245], %247 {strides = array<i32>} : memref<1x8x128xf32, #tpu.memory_space<vmem>>, vector<1x8x128xf32>,
    return
  }
  func.func @transform_0(%arg0: i32) -> (i32, i32, i32) {
    %c0_i32 = arith.constant 0 : i32
    %c0_i32_0 = arith.constant 0 : i32
    %c0_i32_1 = arith.constant 0 : i32
    return %arg0, %c0_i32, %c0_i32_0 : i32, i32, i32
  }
  func.func @transform_1(%arg0: i32) -> (i32, i32, i32) {
    %c0_i32 = arith.constant 0 : i32
    %c0_i32_0 = arith.constant 0 : i32
    %c0_i32_1 = arith.constant 0 : i32
    %c0_i32_2 = arith.constant 0 : i32
    return %c0_i32, %c0_i32_0, %c0_i32_1 : i32, i32, i32
  }
  func.func @transform_2(%arg0: i32) -> (i32, i32, i32) {
    %c0_i32 = arith.constant 0 : i32
    %c0_i32_0 = arith.constant 0 : i32
    %c0_i32_1 = arith.constant 0 : i32
    %c0_i32_2 = arith.constant 0 : i32
    return %c0_i32, %c0_i32_0, %c0_i32_1 : i32, i32, i32
  }
  func.func @transform_3(%arg0: i32) -> (i32, i32, i32) {
    %c0_i32 = arith.constant 0 : i32
    %c0_i32_0 = arith.constant 0 : i32
    %c0_i32_1 = arith.constant 0 : i32
    %c0_i32_2 = arith.constant 0 : i32
    return %c0_i32, %c0_i32_0, %c0_i32_1 : i32, i32, i32
  }
  func.func @transform_4(%arg0: i32) -> (i32, i32, i32) {
    %c0_i32 = arith.constant 0 : i32
    %c0_i32_0 = arith.constant 0 : i32
    %c0_i32_1 = arith.constant 0 : i32
    return %arg0, %c0_i32, %c0_i32_0 : i32, i32, i32
  }
}

</mosaic_0001>

<bundles_post_ra>
// kernel: tpu_custom_call.1
= control target key start
LH: loop header
LB: loop body
LE: loop exit
PB: predicated region body
PF: predicated region fallthrough
CT: control target
= control target key end

     0   :  { %9 = vsyncpa [#allocation6], 0  ;;  %s2534_s0 = inlined_call_operand.hbm [shape: f32[2,4,16], index: 0, kind: input, shape index: {}]   ;;  %s2535_s1 = inlined_call_operand.hbm [shape: bf16[1,8,248], index: 1, kind: input, shape index: {}]   ;;  %s2536_s2 = inlined_call_operand.hbm [shape: bf16[1,8,248], index: 2, kind: input, shape index: {}]   ;;  %s2537_s3 = inlined_call_operand.hbm [shape: f32[4,8,1], index: 3, kind: input, shape index: {}]   ;;  %s2538_s4 = inlined_call_operand.hbm [shape: f32[2,8,128], index: 4, kind: output, shape index: {}]  }
   0x1   :  { %11 = vsyncpa [#allocation6 + $0x1], 0 }
   0x2   :  { %12 = vsyncpa [#allocation9], 0 }
   0x3   :  { %13 = vsyncpa [#allocation12], 0 }
   0x4   :  { %14 = vsyncpa [#allocation7], 0 }
   0x5   :  { %16 = vsyncpa [#allocation7 + $0x1], 0  ;;  %s2132_s15 = smov 0   ;;  %s2134_s16 = smov 0  }
   0x6   :  { %s2136_s17 = smov 0   ;;  %s2138_s18 = smov 0  }
   0x7 LB: > { %s2153_s19 = sadd.s32 4294967295, %s2065_s18   ;;  %s1558_s20 = sadd.s32 4294967294, %s2065_s18   ;;  %s2065_s18 = sphi %s2138_s18, %s2637_s18   ;;  %s2061_s17 = sphi %s2136_s17, %s2636_s17   ;;  %s2057_s16 = sphi %s2134_s16, %s2635_s16   ;;  %s2053_s15 = sphi %s2132_s15, %s2634_s15  }
   0x8   : > { %p42_p0 = scmp.ne.s32.totalorder %s2057_s16, %s2053_s15  ;;  %p2539_p1 = scmp.eq.s32.totalorder %s2153_s19, 0 }
   0x9   : > { %p135_p3 = scmp.eq.s32.totalorder %s1558_s20, 1  ;;  %p1559_p5 = scmp.ge.s32.totalorder %s2065_s18, 1 }
   0xa   : > { %p2162_p4 = por %p2539_p1, %p42_p0  ;;  %p142_p7 = scmp.lt.s32.totalorder %s2065_s18, 3 }
   0xb   : > { %p2167_p6 = por %p135_p3, %p42_p0  ;;  %s2067_s24 = smov [#allocation8]  }
   0xc   : > { %s2580_s21 = scalar_select %p2162_p4, 1, 0 }
   0xd   : > { %s2581_s22 = scalar_select %p2167_p6, 1, 0 }
   0xe   : > { %p2172_p8 = pnand %p1559_p5, %p142_p7  ;;  %s155_s25 = sshll.u32 %s2067_s24, 4  ;;  %s156_s25 = int_to_ptr.vmem [resolvable:$true] %s155_s25 }
   0xf   : > { %s2068_s26 = smov [#allocation10]   ;;  %s2069_s29 = smov [#allocation11]  }
  0x10   : > { %s2582_s23 = scalar_select %p2172_p8, 1, 0 }
  0x11   : > { %p1739_p10 = pneg %p2172_p8  ;;  %s166_s27 = sshll.u32 %s2068_s26, 4  ;;  %s2185_s27 = int_to_ptr.vmem [resolvable:$true] %s166_s27 }
  0x12   : > { %s176_s30 = sshll.u32 %s2069_s29, 4  ;;  %s1877_s7 = scalar_lea.hbm %s2535_s1, 128  ;;  %s2187_s30 = int_to_ptr.vmem [resolvable:$true] %s176_s30 }
  0x13   : > { %p2181_p11 = pnand %p1739_p10, %p2539_p1  ;;  %p1878_p12 = scmp.ne.s32.totalorder %s2535_s1, %s1877_s7 }
  0x14   : > { %p1884_p5 = scmp.lt.u32.totalorder %s1877_s7, %s2535_s1 }
  0x15   : > { %p2197_p13 = pneg %p2181_p11 }
  0x17   : > { %p1880_p0 = pnand %p2197_p13, %p1878_p12 }
  0x19   : > { %p1881_p3 = pneg %p1880_p0 }
  0x1b   : > { %p1886_p7 = pnand %p1884_p5, %p1881_p3 }
  0x1d   : > { %1889 = shalt.err (!%p1886_p7)
}
  0x1e   : > { %s1890_s13 = scalar_lea.vmem %s156_s25, 128  ;;  %p1898_p2 = scmp.lt.s32.totalorder %s156_s25, %s156_s25 }
  0x1f   : > { %p1891_p10 = scmp.ne.s32.totalorder %s156_s25, %s1890_s13  ;;  %p1899_p6 = scmp.lt.s32.totalorder %s1890_s13, %s1890_s13 }
  0x21   : > { %p1893_p9 = pnand %p1891_p10, %p2197_p13  ;;  %p1900_p4 = por %p1899_p6, %p1898_p2 }
  0x23   : > { %p1894_p1 = pneg %p1893_p9 }
  0x25   : > { %p1901_p8 = pnand %p1900_p4, %p1894_p1 }
  0x27   : > { %1904 = shalt.err (!%p1901_p8)
}
  0x28   : > { %1742 = dma.hbm_to_vmem [thread:$0]  (!%p2181_p11), %s2535_s1, 128, %s156_s25, [#allocation9]  }
  0x29   : > { %s1905_s29 = scalar_lea.hbm %s2536_s2, 128 }
  0x2a   : > { %p1906_p9 = scmp.ne.s32.totalorder %s2536_s2, %s1905_s29  ;;  %p1912_p1 = scmp.lt.u32.totalorder %s1905_s29, %s2536_s2 }
  0x2c   : > { %p1908_p12 = pnand %p1906_p9, %p2197_p13 }
  0x2e   : > { %p1909_p2 = pneg %p1908_p12 }
  0x30   : > { %p1914_p4 = pnand %p1912_p1, %p1909_p2 }
  0x32   : > { %1917 = shalt.err (!%p1914_p4)
}
  0x33   : > { %s1918_s25 = scalar_lea.vmem %s2185_s27, 128  ;;  %p1926_p3 = scmp.lt.s32.totalorder %s2185_s27, %s2185_s27 }
  0x34   : > { %p1919_p6 = scmp.ne.s32.totalorder %s2185_s27, %s1918_s25  ;;  %p1927_p5 = scmp.lt.s32.totalorder %s1918_s25, %s1918_s25 }
  0x36   : > { %p1921_p8 = pnand %p1919_p6, %p2197_p13  ;;  %p1928_p7 = por %p1927_p5, %p1926_p3 }
  0x38   : > { %p1922_p0 = pneg %p1921_p8 }
  0x3a   : > { %p1929_p10 = pnand %p1928_p7, %p1922_p0 }
  0x3c   : > { %1932 = shalt.err (!%p1929_p10)
}
  0x3d   : > { %1745 = dma.hbm_to_vmem [thread:$0]  (!%p2181_p11), %s2536_s2, 128, %s2185_s27, [#allocation9]  }
  0x3e   : > { %s1933_s14 = scalar_lea.hbm %s2537_s3, 512 }
  0x3f   : > { %p1934_p9 = scmp.ne.s32.totalorder %s2537_s3, %s1933_s14  ;;  %p1940_p1 = scmp.lt.u32.totalorder %s1933_s14, %s2537_s3 }
  0x41   : > { %p1936_p12 = pnand %p1934_p9, %p2197_p13 }
  0x43   : > { %p1937_p2 = pneg %p1936_p12 }
  0x45   : > { %p1942_p4 = pnand %p1940_p1, %p1937_p2 }
  0x47   : > { %1945 = shalt.err (!%p1942_p4)
}
  0x48   : > { %s1946_s27 = scalar_lea.vmem %s2187_s30, 512  ;;  %p1954_p3 = scmp.lt.s32.totalorder %s2187_s30, %s2187_s30 }
  0x49   : > { %p1947_p6 = scmp.ne.s32.totalorder %s2187_s30, %s1946_s27  ;;  %p1955_p5 = scmp.lt.s32.totalorder %s1946_s27, %s1946_s27 }
  0x4b   : > { %p1949_p8 = pnand %p1947_p6, %p2197_p13  ;;  %p1956_p7 = por %p1955_p5, %p1954_p3 }
  0x4d   : > { %p1950_p0 = pneg %p1949_p8 }
  0x4f   : > { %p1957_p10 = pnand %p1956_p7, %p1950_p0 }
  0x51   : > { %1960 = shalt.err (!%p1957_p10)
}
  0x52   : > { %s2070_s5 = smov 128   ;;  %s2071_s10 = smov 8  }
  0x53   : > { %1748 = dma.hbm_to_vmem [thread:$0]  (!%p2181_p11), %s2537_s3, 512, %s2187_s30, [#allocation12], %s2070_s5, %s2070_s5, %s2071_s10  }
  0x54   : > { %s2260_s8 = sadd.s32 1, %s2065_s18   ;;  %s29_s9 = sadd.s32 1, %s2061_s17 }
  0x55   : > { %s26_s25 = ssub.s32 %s2065_s18, %s2260_s8  ;;  %p36_p9 = scmp.ne.s32.totalorder %s2061_s17, %s2057_s16 }
  0x56   : > { %p27_p13 = scmp.eq.s32.totalorder %s26_s25, 0  ;;  %p37_p12 = scmp.eq.s32.totalorder %s2065_s18, 0 }
  0x57   : > { %p1760_p2 = scmp.lt.s32.totalorder %s2065_s18, 2  ;;  %p2585_p4 = scmp.eq.s32.totalorder %s2153_s19, 1 }
  0x58   : > { %s2270_s11 = scalar_select %p27_p13, %s2061_s17, %s29_s9  }
  0x59   : > { %p38_p1 = por %p37_p12, %p36_p9  ;;  %p2274_p6 = por %p2585_p4, %p36_p9 }
  0x5a   : > { %s190_s28 = sand.u32 1, %s2061_s17   ;;  %s1565_s13 = sshll.u32 %s2065_s18, 6 }
  0x5b   : > { %s1564_s30 = sshll.u32 %s190_s28, 2  ;;  %s2283_s24 = scalar_lea.hbm %s2534_s0, %s1565_s13 }
  0x5c   : > { %s194_s26 = scalar_lea.vmem [#allocation5], %s1564_s30  ;;  %p2285_p11 = pnand %p1760_p2, %p38_p1 }
  0x5d   : > { %s201_s29 = sshll.u32 %s194_s26, 4  ;;  %s191_s5 = scalar_lea.sflag [#allocation6], %s190_s28  ;;  %s2289_s29 = int_to_ptr.vmem [resolvable:$true] %s201_s29 }
  0x5e   : > { %s1961_s10 = scalar_lea.hbm %s2283_s24, 64  ;;  %p1963_p0 = pneg %p2285_p11 }
  0x5f   : > { %p1962_p8 = scmp.ne.s32.totalorder %s2283_s24, %s1961_s10  ;;  %s1966_s25 = scalar_lea.hbm %s2534_s0, 128 }
  0x60   : > { %p1967_p7 = scmp.lt.u32.totalorder %s2283_s24, %s2534_s0  ;;  %p1968_p10 = scmp.lt.u32.totalorder %s1966_s25, %s1961_s10 }
  0x61   : > { %p1964_p3 = pnand %p1963_p0, %p1962_p8  ;;  %p1970_p9 = scmp.lt.u32.totalorder %s1961_s10, %s2283_s24 }
  0x62   : > { %p1969_p13 = por %p1968_p10, %p1967_p7 }
  0x63   : > { %p1965_p5 = pneg %p1964_p3 }
  0x64   : > { %p1971_p12 = por %p1970_p9, %p1969_p13 }
  0x66   : > { %p1972_p2 = pnand %p1971_p12, %p1965_p5 }
  0x68   : > { %1975 = shalt.err (!%p1972_p2)
}
  0x69   : > { %s1976_s28 = scalar_lea.vmem %s2289_s29, 64  ;;  %s2072_s30 = smov [#allocation5]  }
  0x6a   : > { %p1977_p1 = scmp.ne.s32.totalorder %s2289_s29, %s1976_s28  ;;  %s1981_s14 = sshll.u32 %s2072_s30, 4  ;;  %s1982_s14 = int_to_ptr.vmem [resolvable:$false] %s1981_s14 }
  0x6b   : > { %s1983_s20 = scalar_lea.vmem %s1982_s14, 128  ;;  %p1984_p3 = scmp.lt.s32.totalorder %s2289_s29, %s1982_s14 }
  0x6c   : > { %p1979_p4 = pnand %p1977_p1, %p1963_p0  ;;  %p1985_p7 = scmp.lt.s32.totalorder %s1983_s20, %s1976_s28 }
  0x6e   : > { %p1980_p8 = pneg %p1979_p4  ;;  %p1986_p10 = por %p1985_p7, %p1984_p3 }
  0x70   : > { %p1987_p13 = pnand %p1986_p10, %p1980_p8 }
  0x72   : > { %1990 = shalt.err (!%p1987_p13)
}
  0x73   : > { %1752 = dma.hbm_to_vmem [thread:$0]  (!%p2285_p11), %s2283_s24, 64, %s2289_s29, %s191_s5  }
  0x74   : > { %p2588_p5 = scmp.ne.s32.totalorder %s2582_s23, 0 }
  0x75   : > { %s2319_s26 = sand.u32 (!%p2588_p5), 1, %s2057_s16   ;;  %p2589_p0 = scmp.ne.s32.totalorder (!%p2588_p5), %s2580_s21, 0 }
  0x76   : > { %210 = sbr.rel (%p2588_p5) target bundleno = 1824 (0x720), region = 36  ;;  %s1567_s10 = sshll.u32 (!%p2588_p5), %s2319_s26, 2 }
  0x77   : > { %s213_s6 = scalar_lea.sflag (!%p2588_p5), [#allocation6], %s2319_s26  ;;  %s216_s7 = scalar_lea.vmem (!%p2588_p5), [#allocation5], %s1567_s10 }
  0x7d   : > { %2036 = dma.done.wait (%p2589_p0), %s213_s6, 64  }
  0x7e   : > { %2038 = vsyncadd (%p2589_p0), %s213_s6, 4294967232  ;;  %p2590_p9 = scmp.eq.s32.totalorder %s2153_s19, 0 }
  0x80   : > { %2040 = dma.done.wait (%p2590_p9), [#allocation9], 256   ;;  %p2591_p11 = pmov %p2590_p9 }
  0x81   : > { %p2592_p12 = pmov %p2590_p9 }
  0x82   : > { %2042 = vsyncadd (%p2591_p11), [#allocation9], 4294967040 }
  0x83   : > { %2044 = dma.done.wait (%p2592_p12), [#allocation12], 512   ;;  %p2593_p2 = pmov %p2590_p9 }
  0x84   : > { %vm255_vm0 = vcmask 244736   ;;  %v2073_v0 = vmov 0.0   ;;  %v257_v1 = vld [vmem:[%s216_s7] sm:$0xf]  ;;  %s2074_s21 = smov 15   ;;  %vm262_vm1 = vcmask 248952  }
  0x85   : > { %2046 = vsyncadd (%p2593_p2), [#allocation12], 4294966784  ;;  %254 = vst [vmem:[#allocation2] sm:$0xff] %v2073_v0  ;;  %259 = vrot.lane.b32.xlu0 %v257_v1, %s2074_s21  ;;  %s2075_s23 = smov 111   ;;  %s2076_s24 = smov 112   ;;  %v2366_v7 = vld [vmem:[#allocation8] sm:$0xff] }
  0x86   : > { %256 = vst.msk [vmem:[#allocation2 + $0x8] sm:$0xff] %vm255_vm0, %v2073_v0  ;;  %s2548_s29 = smov 110   ;;  %s2078_s27 = smov 127   ;;  %v1604_v8 = vcombine.high %v2366_v7, %v2366_v7  ;;  %vm407_vm2 = vcmask 982016   ;;  %vm551_vm3 = vcmask 908288   ;;  %vm535_vm4 = vcmask 916480  }
  0x87   : > { %s2544_s5 = smov 126   ;;  %s2546_s25 = smov 109   ;;  %vm567_vm5 = vcmask 900096   ;;  %vm295_vm6 = vcmask 1039360   ;;  %vm2562_vm7 = vcmask 1031168   ;;  %vm583_vm8 = vcmask 891904  }
  0x88   : > { %s2542_s9 = smov 108   ;;  %s2082_s13 = smov 125   ;;  %1621 = vmatprep.mubr.msk.bf16.mxu0 %vm407_vm2, %v1604_v8  ;;  %vm2561_vm9 = vcmask 883712   ;;  %vm327_vm10 = vcmask 1022976   ;;  %vm2559_vm11 = vcmask 1014784   ;;  %vm615_vm12 = vcmask 875520  }
  0x89   : > { %s2543_s28 = smov 124   ;;  %s2084_s30 = smov 107   ;;  %vm2557_vm13 = vcmask 867328   ;;  %vm359_vm14 = vcmask 1006592   ;;  %vm2558_vm15 = vcmask 998400   ;;  %vm647_vm0 = vcmask 859136  }
  0x8a   : > { %s2545_s14 = smov 106   ;;  %s2086_s20 = smov 123  }
  0x8b   : > { %s2547_s10 = smov 122   ;;  %s2088_s6 = smov 105  }
  0x8c   : > { %s2549_s7 = smov 104  }
  0x8d   : > { %v540_v3 = vld [vmem:[#allocation2 + $0x8] sm:$0xff] }
  0xf7   : > { %v260_v2 = vpop.permute.xlu0 %259 }
  0xf8   : > { %263 = vst.msk [vmem:[#allocation2] sm:$0xf] %vm262_vm1, %v260_v2  ;;  %vm2560_vm1 = vcmask 850944  }
  0xff   : > { %v539_v4 = vld [vmem:[#allocation2] sm:$0xff] }
 0x100   : > { %v1662_v5 = vpack.c.bf16 %v540_v3, %v539_v4  ;;  %v281_v6 = vpack.c.bf16 %v539_v4, %v539_v4 }
 0x102   : > { %548 = vrot.lane.b32.xlu1 %v1662_v5, %s2075_s23  ;;  %532 = vrot.lane.b32.xlu0 %v1662_v5, %s2076_s24  ;;  %282 = vst [vmem:[#allocation4] sm:$0xf] %v281_v6 }
 0x106   : > { %564 = vrot.lane.b32.xlu0 %v1662_v5, %s2548_s29  ;;  %292 = vrot.lane.b32.xlu1 %v1662_v5, %s2078_s27  ;;  %s2096_s29 = smov 101  }
 0x10a   : > { %308 = vrot.lane.b32.xlu0 %v1662_v5, %s2544_s5  ;;  %580 = vrot.lane.b32.xlu1 %v1662_v5, %s2546_s25  ;;  %s2552_s5 = smov 103   ;;  %s2554_s25 = smov 119  }
 0x10e   : > { %596 = vrot.lane.b32.xlu0 %v1662_v5, %s2542_s9  ;;  %324 = vrot.lane.b32.xlu1 %v1662_v5, %s2082_s13  ;;  %s2550_s9 = smov 121  }
 0x112   : > { %340 = vrot.lane.b32.xlu0 %v1662_v5, %s2543_s28  ;;  %612 = vrot.lane.b32.xlu1 %v1662_v5, %s2084_s30  ;;  %s2551_s28 = smov 120  }
 0x116   : > { %628 = vrot.lane.b32.xlu0 %v1662_v5, %s2545_s14  ;;  %356 = vrot.lane.b32.xlu1 %v1662_v5, %s2086_s20  ;;  %s2553_s14 = smov 102  }
 0x11a   : > { %372 = vrot.lane.b32.xlu0 %v1662_v5, %s2547_s10  ;;  %644 = vrot.lane.b32.xlu1 %v1662_v5, %s2088_s6  ;;  %s2555_s10 = smov 118  }
 0x11e   : > { %660 = vrot.lane.b32.xlu0 %v1662_v5, %s2549_s7  ;;  %388 = vrot.lane.b32.xlu1 %v1662_v5, %s2550_s9  ;;  %s2556_s7 = smov 100   ;;  %s2098_s9 = smov 117  }
 0x122   : > { %404 = vrot.lane.b32.xlu0 %v1662_v5, %s2551_s28  ;;  %676 = vrot.lane.b32.xlu1 %v1662_v5, %s2552_s5  ;;  %s2579_s28 = smov 116   ;;  %s2100_s5 = smov 99  }
 0x126   : > { %692 = vrot.lane.b32.xlu0 %v1662_v5, %s2553_s14  ;;  %420 = vrot.lane.b32.xlu1 %v1662_v5, %s2554_s25  ;;  %s2578_s14 = smov 98   ;;  %s2102_s25 = smov 115  }
 0x12a   : > { %436 = vrot.lane.b32.xlu0 %v1662_v5, %s2555_s10  ;;  %708 = vrot.lane.b32.xlu1 %v1662_v5, %s2096_s29  ;;  %s2576_s10 = smov 113  }
 0x12e   : > { %724 = vrot.lane.b32.xlu0 %v1662_v5, %s2556_s7  ;;  %452 = vrot.lane.b32.xlu1 %v1662_v5, %s2098_s9  ;;  %s2104_s7 = smov 114  }
 0x132   : > { %468 = vrot.lane.b32.xlu0 %v1662_v5, %s2579_s28  ;;  %740 = vrot.lane.b32.xlu1 %v1662_v5, %s2100_s5  ;;  %s2597_s28 = smov 103  }
 0x136   : > { %756 = vrot.lane.b32.xlu0 %v1662_v5, %s2578_s14  ;;  %484 = vrot.lane.b32.xlu1 %v1662_v5, %s2102_s25  ;;  %s2596_s14 = smov 109  }
 0x13a   : > { %516 = vrot.lane.b32.xlu0 %v1662_v5, %s2576_s10  ;;  %500 = vrot.lane.b32.xlu1 %v1662_v5, %s2104_s7  ;;  %s2595_s10 = smov 121  }
 0x174   : > { %v549_v9 = vpop.permute.xlu1 %548  ;;  %v533_v10 = vpop.permute.xlu0 %532 }
 0x175   : > { %v550_v11 = vrot.slane %v549_v9, 4  ;;  %v534_v12 = vrot.slane %v533_v10, 4 }
 0x177   : > { %v552_v13 = vsel %vm551_vm3, %v549_v9, %v550_v11  ;;  %v536_v14 = vsel %vm535_vm4, %v533_v10, %v534_v12 }
 0x178   : > { %554 = vst [vmem:[#allocation4 + $0x44] sm:$0xf] %v552_v13  ;;  %538 = vst [vmem:[#allocation4 + $0x40] sm:$0xf] %v536_v14  ;;  %v565_v15 = vpop.permute.xlu0 %564  ;;  %v293_v16 = vpop.permute.xlu1 %292 }
 0x179   : > { %v566_v17 = vrot.slane %v565_v15, 4  ;;  %v294_v18 = vrot.slane %v293_v16, 4 }
 0x17b   : > { %v568_v19 = vsel %vm567_vm5, %v565_v15, %v566_v17  ;;  %v296_v20 = vsel %vm295_vm6, %v293_v16, %v294_v18 }
 0x17c   : > { %570 = vst [vmem:[#allocation4 + $0x48] sm:$0xf] %v568_v19  ;;  %298 = vst [vmem:[#allocation4 + $0x4] sm:$0xf] %v296_v20  ;;  %v309_v21 = vpop.permute.xlu0 %308  ;;  %v581_v22 = vpop.permute.xlu1 %580 }
 0x17d   : > { %v310_v23 = vrot.slane %v309_v21, 4  ;;  %v582_v24 = vrot.slane %v581_v22, 4 }
 0x17f   : > { %v312_v25 = vsel %vm2562_vm7, %v309_v21, %v310_v23  ;;  %v584_v26 = vsel %vm583_vm8, %v581_v22, %v582_v24  ;;  %v1837_v27 = vld [vmem:[#allocation4 + $0x40] sm:$0xff]   ;;  %vm2566_vm7 = vcmask 826368  }
 0x180   : > { %314 = vst [vmem:[#allocation4 + $0x8] sm:$0xf] %v312_v25  ;;  %586 = vst [vmem:[#allocation4 + $0x4c] sm:$0xf] %v584_v26  ;;  %v597_v28 = vpop.permute.xlu0 %596  ;;  %v325_v29 = vpop.permute.xlu1 %324  ;;  %1677 = vmatprep.subr.bf16.mxu0 %v1837_v27 }
 0x181   : > { %v598_v30 = vrot.slane %v597_v28, 4  ;;  %v326_v31 = vrot.slane %v325_v29, 4 }
 0x183   : > { %v600_v32 = vsel %vm2561_vm9, %v597_v28, %v598_v30  ;;  %v328_v33 = vsel %vm327_vm10, %v325_v29, %v326_v31  ;;  %v1838_v34 = vld [vmem:[#allocation4] sm:$0xff]   ;;  %vm2565_vm9 = vcmask 965632  }
 0x184   : > { %602 = vst [vmem:[#allocation4 + $0x50] sm:$0xf] %v600_v32  ;;  %330 = vst [vmem:[#allocation4 + $0xc] sm:$0xf] %v328_v33  ;;  %v341_v35 = vpop.permute.xlu0 %340  ;;  %v613_v36 = vpop.permute.xlu1 %612  ;;  %1678 = vmatpush3.bf16.msra.mxu0 %v1838_v34 }
 0x185   : > { %v342_v37 = vrot.slane %v341_v35, 4  ;;  %v614_v38 = vrot.slane %v613_v36, 4 }
 0x187   : > { %v344_v39 = vsel %vm2559_vm11, %v341_v35, %v342_v37  ;;  %v616_v40 = vsel %vm615_vm12, %v613_v36, %v614_v38  ;;  %v1839_v41 = vld [vmem:[#allocation4 + $0x48] sm:$0xff]   ;;  %vm2563_vm11 = vcmask 834560  }
 0x188   : > { %346 = vst [vmem:[#allocation4 + $0x10] sm:$0xf] %v344_v39  ;;  %618 = vst [vmem:[#allocation4 + $0x54] sm:$0xf] %v616_v40  ;;  %v629_v42 = vpop.permute.xlu0 %628  ;;  %v357_v43 = vpop.permute.xlu1 %356  ;;  %1679 = vmatprep.subr.bf16.mxu0 %v1839_v41 }
 0x189   : > { %v630_v44 = vrot.slane %v629_v42, 4  ;;  %v358_v45 = vrot.slane %v357_v43, 4 }
 0x18b   : > { %v632_v46 = vsel %vm2557_vm13, %v629_v42, %v630_v44  ;;  %v360_v47 = vsel %vm359_vm14, %v357_v43, %v358_v45  ;;  %v1840_v48 = vld [vmem:[#allocation4 + $0x8] sm:$0xff]   ;;  %vm391_vm13 = vcmask 990208  }
 0x18c   : > { %634 = vst [vmem:[#allocation4 + $0x58] sm:$0xf] %v632_v46  ;;  %362 = vst [vmem:[#allocation4 + $0x14] sm:$0xf] %v360_v47  ;;  %v373_v49 = vpop.permute.xlu0 %372  ;;  %v645_v50 = vpop.permute.xlu1 %644  ;;  %1680 = vmatpush3.bf16.msra.mxu0 %v1840_v48 }
 0x18d   : > { %v374_v51 = vrot.slane %v373_v49, 4  ;;  %v646_v52 = vrot.slane %v645_v50, 4 }
 0x18f   : > { %v376_v53 = vsel %vm2558_vm15, %v373_v49, %v374_v51  ;;  %v648_v54 = vsel %vm647_vm0, %v645_v50, %v646_v52  ;;  %v1841_v55 = vld [vmem:[#allocation4 + $0x50] sm:$0xff]   ;;  %vm679_vm15 = vcmask 842752  }
 0x190   : > { %378 = vst [vmem:[#allocation4 + $0x18] sm:$0xf] %v376_v53  ;;  %650 = vst [vmem:[#allocation4 + $0x5c] sm:$0xf] %v648_v54  ;;  %v661_v56 = vpop.permute.xlu0 %660  ;;  %v389_v57 = vpop.permute.xlu1 %388  ;;  %1681 = vmatprep.subr.bf16.mxu0 %v1841_v55  ;;  %v1603_v53 = vcombine.low %v2366_v7, %v2366_v7  ;;  %v268_v54 = vlaneseq  ;;  %v2105_v7 = vmov 0  }
 0x191   : > { %v662_v58 = vrot.slane %v661_v56, 4  ;;  %v390_v59 = vrot.slane %v389_v57, 4  ;;  %1835 = vset.pattern.permute.xlu0 %v2105_v7  ;;  %1836 = vset.pattern.permute.xlu1 %v2105_v7 }
 0x192   : > { %v269_v55 = vand.u32 127, %v268_v54 }
 0x193   : > { %v664_v60 = vsel %vm2560_vm1, %v661_v56, %v662_v58  ;;  %v392_v61 = vsel %vm391_vm13, %v389_v57, %v390_v59  ;;  %v1842_v62 = vld [vmem:[#allocation4 + $0x10] sm:$0xff]   ;;  %vm2564_vm1 = vcmask 973824  }
 0x194   : > { %666 = vst [vmem:[#allocation4 + $0x60] sm:$0xf] %v664_v60  ;;  %394 = vst [vmem:[#allocation4 + $0x1c] sm:$0xf] %v392_v61  ;;  %v405_v63 = vpop.permute.xlu0 %404  ;;  %v677_v1 = vpop.permute.xlu1 %676  ;;  %1682 = vmatpush3.bf16.msra.mxu0 %v1842_v62 }
 0x195   : > { %v406_v2 = vrot.slane %v405_v63, 4  ;;  %v678_v3 = vrot.slane %v677_v1, 4 }
 0x197   : > { %v408_v4 = vsel %vm407_vm2, %v405_v63, %v406_v2  ;;  %v680_v5 = vsel %vm679_vm15, %v677_v1, %v678_v3  ;;  %v1843_v6 = vld [vmem:[#allocation4 + $0x58] sm:$0xff]  }
 0x198   : > { %410 = vst [vmem:[#allocation4 + $0x20] sm:$0xf] %v408_v4  ;;  %682 = vst [vmem:[#allocation4 + $0x64] sm:$0xf] %v680_v5  ;;  %v693_v8 = vpop.permute.xlu0 %692  ;;  %v421_v9 = vpop.permute.xlu1 %420  ;;  %1683 = vmatprep.subr.bf16.mxu0 %v1843_v6 }
 0x199   : > { %v694_v10 = vrot.slane %v693_v8, 4  ;;  %v422_v11 = vrot.slane %v421_v9, 4 }
 0x19b   : > { %v696_v12 = vsel %vm2563_vm11, %v693_v8, %v694_v10  ;;  %v424_v13 = vsel %vm2564_vm1, %v421_v9, %v422_v11  ;;  %v1844_v14 = vld [vmem:[#allocation4 + $0x18] sm:$0xff]   ;;  %vm2567_vm11 = vcmask 818176   ;;  %vm2568_vm1 = vcmask 957440  }
 0x19c   : > { %698 = vst [vmem:[#allocation4 + $0x68] sm:$0xf] %v696_v12  ;;  %426 = vst [vmem:[#allocation4 + $0x24] sm:$0xf] %v424_v13  ;;  %v437_v15 = vpop.permute.xlu0 %436  ;;  %v709_v16 = vpop.permute.xlu1 %708  ;;  %1684 = vmatpush3.bf16.msra.mxu0 %v1844_v14  ;;  %v273_v9 = vld [vmem:[#allocation11] sm:$0xff]  ;;  %v275_v12 = vld [vmem:[#allocation11 + $0x8] sm:$0xff] }
 0x19d   : > { %v438_v17 = vrot.slane %v437_v15, 4  ;;  %v710_v18 = vrot.slane %v709_v16, 4 }
 0x19f   : > { %v440_v19 = vsel %vm2565_vm9, %v437_v15, %v438_v17  ;;  %v712_v20 = vsel %vm2566_vm7, %v709_v16, %v710_v18  ;;  %v1845_v21 = vld [vmem:[#allocation4 + $0x60] sm:$0xff]   ;;  %vm2569_vm9 = vcmask 949248   ;;  %vm2570_vm7 = vcmask 809984  }
 0x1a0   : > { %442 = vst [vmem:[#allocation4 + $0x28] sm:$0xf] %v440_v19  ;;  %714 = vst [vmem:[#allocation4 + $0x6c] sm:$0xf] %v712_v20  ;;  %v725_v22 = vpop.permute.xlu0 %724  ;;  %v453_v23 = vpop.permute.xlu1 %452  ;;  %1685 = vmatprep.subr.bf16.mxu0 %v1845_v21 }
 0x1a1   : > { %v726_v24 = vrot.slane %v725_v22, 4  ;;  %v454_v25 = vrot.slane %v453_v23, 4 }
 0x1a3   : > { %v728_v26 = vsel %vm2567_vm11, %v725_v22, %v726_v24  ;;  %v456_v27 = vsel %vm2568_vm1, %v453_v23, %v454_v25  ;;  %v1846_v28 = vld [vmem:[#allocation4 + $0x20] sm:$0xff]   ;;  %vm2571_vm11 = vcmask 801792   ;;  %vm2574_vm1 = vcmask 941056  }
 0x1a4   : > { %730 = vst [vmem:[#allocation4 + $0x70] sm:$0xf] %v728_v26  ;;  %458 = vst [vmem:[#allocation4 + $0x2c] sm:$0xf] %v456_v27  ;;  %v469_v29 = vpop.permute.xlu0 %468  ;;  %v741_v30 = vpop.permute.xlu1 %740  ;;  %1686 = vmatpush3.bf16.msra.mxu0 %v1846_v28  ;;  %v2442_v27 = vld [vmem:[#allocation10] sm:$0xff] }
 0x1a5   : > { %v470_v31 = vrot.slane %v469_v29, 4  ;;  %v742_v32 = vrot.slane %v741_v30, 4  ;;  %v1624_v28 = vcombine.high %v2442_v27, %v2442_v27 }
 0x1a7   : > { %v472_v33 = vsel %vm2569_vm9, %v469_v29, %v470_v31  ;;  %v744_v34 = vsel %vm2570_vm7, %v741_v30, %v742_v32  ;;  %v1847_v35 = vld [vmem:[#allocation4 + $0x68] sm:$0xff]   ;;  %vm2572_vm9 = vcmask 924672   ;;  %vm2573_vm7 = vcmask 932864   ;;  %1641 = vmatprep.mubr.msk.bf16.mxu1 %vm407_vm2, %v1624_v28 }
 0x1a8   : > { %474 = vst [vmem:[#allocation4 + $0x30] sm:$0xf] %v472_v33  ;;  %746 = vst [vmem:[#allocation4 + $0x74] sm:$0xf] %v744_v34  ;;  %v757_v36 = vpop.permute.xlu0 %756  ;;  %v485_v37 = vpop.permute.xlu1 %484  ;;  %1687 = vmatprep.subr.bf16.mxu0 %v1847_v35 }
 0x1a9   : > { %v758_v38 = vrot.slane %v757_v36, 4  ;;  %v486_v39 = vrot.slane %v485_v37, 4 }
 0x1ab   : > { %v760_v40 = vsel %vm2571_vm11, %v757_v36, %v758_v38  ;;  %v488_v41 = vsel %vm2574_vm1, %v485_v37, %v486_v39  ;;  %v1848_v42 = vld [vmem:[#allocation4 + $0x28] sm:$0xff]   ;;  %vm2575_vm11 = vcmask 1043456  }
 0x1ac   : > { %762 = vst [vmem:[#allocation4 + $0x78] sm:$0xf] %v760_v40  ;;  %490 = vst [vmem:[#allocation4 + $0x34] sm:$0xf] %v488_v41  ;;  %v517_v43 = vpop.permute.xlu0 %516  ;;  %v501_v44 = vpop.permute.xlu1 %500  ;;  %1688 = vmatpush3.bf16.msra.mxu0 %v1848_v42 }
 0x1ad   : > { %v518_v45 = vrot.slane %v517_v43, 4  ;;  %v502_v46 = vrot.slane %v501_v44, 4 }
 0x1af   : > { %v520_v47 = vsel %vm2572_vm9, %v517_v43, %v518_v45  ;;  %v504_v48 = vsel %vm2573_vm7, %v501_v44, %v502_v46  ;;  %v1849_v49 = vld [vmem:[#allocation4 + $0x70] sm:$0xff]   ;;  %vm270_vm9 = vcmp.lt.s32.totalorder %v269_v55, 16  ;;  %vm265_vm7 = vcmask 244740  }
 0x1b0   : > { %522 = vst [vmem:[#allocation4 + $0x3c] sm:$0xf] %v520_v47  ;;  %506 = vst [vmem:[#allocation4 + $0x38] sm:$0xf] %v504_v48  ;;  %1689 = vmatprep.subr.bf16.mxu0 %v1849_v49  ;;  %v2407_v58 = vsel %vm270_vm9, 1.0, %v2073_v0  ;;  %vm982_vm9 = vcmask 121860  }
 0x1b1   : > { %vm266_vm1 = vmor %vm265_vm7, %vm2575_vm11  ;;  %vm981_vm7 = vcmask 1043576  }
 0x1b2   : > { %267 = vst.msk [vmem:[#allocation3] sm:$0xff] %vm266_vm1, %v2105_v7  ;;  %vm978_vm1 = vcmask 121856  }
 0x1b3   : > { %v1850_v50 = vld [vmem:[#allocation4 + $0x30] sm:$0xff]   ;;  %v1851_v51 = vld [vmem:[#allocation4 + $0x78] ss:$0 sps:$4 sm:$0xff]  }
 0x1b4   : > { %1690 = vmatpush3.bf16.msra.mxu0 %v1850_v50 }
 0x1b5   : > { %1721 = vmatprep.subr.msk.bf16.mxu0 %vm2575_vm11, %v1851_v51  ;;  %vm983_vm11 = vmor %vm982_vm9, %vm981_vm7  ;;  %vm2624_vm7 = vcmask 834560   ;;  %vm2625_vm9 = vcmask 965632  }
 0x1b7   : > { %v1852_v52 = vld [vmem:[#allocation4 + $0x38] sm:$0xff]  }
 0x1b8   : > { %1692 = vmatpush3.bf16.msra.mxu0 %v1852_v52 }
 0x1bb   : > { %934 = vmatmul.mubr.bf16.vlgmr.msra.gmra.mrb[0].mxu0 %v1603_v53 }
 0x28e   : > { %v1693_v56 = vpop.f32.mrb[0].mxu0 }
 0x28f   : > { %v1694_v57 = vpop.f32.mrb[1].mxu0 }
 0x290   : > { %v1695_v59 = vadd.f32 %v1694_v57, %v1693_v56  ;;  %v1696_v60 = vpop.f32.mrb[2].mxu0 }
 0x291   : > { %v1697_v61 = vpop.f32.mrb[3].mxu0 }
 0x292   : > { %v941_v62 = vmul.f32 %v1695_v59, %v2407_v58 }
 0x294   : > { %942 = vadd.xlane.f32.xlu1 %v941_v62  ;;  %v944_v63 = vmul.f32 %v1695_v59, %v941_v62 }
 0x296   : > { %945 = vadd.xlane.f32.xlu0 %v944_v63 }
 0x321   : > { %v943_v1 = vpop.xlane.xlu1 %942 }
 0x322   : > { %v947_v2 = vmul.f32 0.0625, %v943_v1 }
 0x323   : > { %v946_v3 = vpop.xlane.xlu0 %945 }
 0x324   : > { %v949_v0 = vmul.f32 %v947_v2, %v947_v2  ;;  %v948_v4 = vmul.f32 0.0625, %v946_v3 }
 0x326   : > { %v950_v5 = vsub.f32 %v948_v4, %v949_v0 }
 0x328   : > { %v951_v6 = vmax.f32 %v950_v5, 0.0 }
 0x32a   : > { %v952_v8 = vadd.f32 1e-05, %v951_v6 }
 0x32c   : > { %1873 = vrsqrt.f32 %v952_v8 }
 0x336   : > { %v1874_v10 = vpop.eup %1873 }
 0x337   : > { %v954_v11 = vmul.f32 %v1874_v10, %v273_v9 }
 0x339   : > { %959 = vperm.xlu0 %1835, %v954_v11   ;;  %v955_v13 = vmul.f32 %v954_v11, %v947_v2 }
 0x33b   : > { %v956_v14 = vsub.f32 %v275_v12, %v955_v13 }
 0x33d   : > { %965 = vperm.xlu1 %1836, %v956_v14  }
 0x3b8   : > { %v960_v15 = vpop.permute.xlu0 %959 }
 0x3b9   : > { %v962_v16 = vmul.f32 %v1695_v59, %v960_v15 }
 0x3bc   : > { %v966_v17 = vpop.permute.xlu1 %965 }
 0x3bd   : > { %v968_v18 = vadd.f32 %v966_v17, %v962_v16 }
 0x3bf   : > { %v969_v19 = vmax.f32 %v968_v18, 0.0 }
 0x3c1   : > { %v970_v20 = vmul.f32 %v2407_v58, %v969_v19 }
 0x3c3   : > { %v1676_v21 = vpack.c.bf16 %v970_v20, %v970_v20 }
 0x3c5   : > { %975 = vrot.lane.b32.xlu1 %v1676_v21, %s2074_s21  ;;  %s2594_s21 = smov 110  }
 0x437   : > { %v976_v22 = vpop.permute.xlu1 %975 }
 0x438   : > { %v977_v23 = vrot.slane %v976_v22, 4 }
 0x43a   : > { %v979_v24 = vsel %vm978_vm1, %v977_v23, %v976_v22  ;;  %vm2627_vm1 = vcmask 949248  }
 0x43b   : > { %984 = vst.msk [vmem:[#allocation3] sm:$0xff] %vm983_vm11, %v979_v24  ;;  %vm2618_vm11 = vcmask 867328  }
 0x442   : > { %v985_v25 = vld [vmem:[#allocation3] sm:$0xf] }
 0x443   : > { %v1107_v26 = vld [vmem:[#allocation3] sm:$0xff]  ;;  %986 = vst [vmem:[#allocation4] sm:$0xf] %v985_v25 }
 0x444   : > { %1109 = vrot.lane.b32.xlu1 %v1107_v26, %s2076_s24  ;;  %1005 = vrot.lane.b32.xlu0 %v1107_v26, %s2082_s13  ;;  %s2598_s24 = smov 126   ;;  %s2599_s13 = smov 119  }
 0x448   : > { %1117 = vrot.lane.b32.xlu1 %v1107_v26, %s2075_s23  ;;  %1149 = vrot.lane.b32.xlu0 %v1107_v26, %s2084_s30  ;;  %s2600_s23 = smov 108   ;;  %s2601_s30 = smov 124  }
 0x44c   : > { %1021 = vrot.lane.b32.xlu0 %v1107_v26, %s2086_s20  ;;  %989 = vrot.lane.b32.xlu1 %v1107_v26, %s2078_s27  ;;  %s2602_s27 = smov 106   ;;  %s2603_s20 = smov 122  }
 0x450   : > { %1165 = vrot.lane.b32.xlu0 %v1107_v26, %s2088_s6  ;;  %1125 = vrot.lane.b32.xlu1 %v1107_v26, %s2594_s21  ;;  %s2608_s6 = smov 100   ;;  %s2610_s21 = smov 98  }
 0x454   : > { %1037 = vrot.lane.b32.xlu0 %v1107_v26, %s2595_s10  ;;  %1133 = vrot.lane.b32.xlu1 %v1107_v26, %s2596_s14  ;;  %s2605_s14 = smov 120   ;;  %s2606_s10 = smov 102  }
 0x458   : > { %1181 = vrot.lane.b32.xlu0 %v1107_v26, %s2597_s28  ;;  %997 = vrot.lane.b32.xlu1 %v1107_v26, %s2598_s24  ;;  %s2604_s28 = smov 104  }
 0x45c   : > { %1053 = vrot.lane.b32.xlu0 %v1107_v26, %s2599_s13  ;;  %1141 = vrot.lane.b32.xlu1 %v1107_v26, %s2600_s23 }
 0x460   : > { %1197 = vrot.lane.b32.xlu0 %v1107_v26, %s2096_s29  ;;  %1013 = vrot.lane.b32.xlu1 %v1107_v26, %s2601_s30  ;;  %s2607_s29 = smov 118  }
 0x464   : > { %1069 = vrot.lane.b32.xlu0 %v1107_v26, %s2098_s9  ;;  %1157 = vrot.lane.b32.xlu1 %v1107_v26, %s2602_s27  ;;  %s2609_s9 = smov 116  }
 0x468   : > { %1213 = vrot.lane.b32.xlu0 %v1107_v26, %s2100_s5  ;;  %1029 = vrot.lane.b32.xlu1 %v1107_v26, %s2603_s20  ;;  %s2611_s5 = smov 113  }
 0x46c   : > { %1085 = vrot.lane.b32.xlu0 %v1107_v26, %s2102_s25  ;;  %1173 = vrot.lane.b32.xlu1 %v1107_v26, %s2604_s28  ;;  %s1571_s25 = sshll.u32 %s2319_s26, 3  ;;  %s2106_s28 = smov [#allocation13]  }
 0x46d   : > { %s252_s24 = scalar_lea.vmem [#allocation13], %s1571_s25 }
 0x46e   : > { %s1459_s13 = sshll.u32 %s252_s24, 4  ;;  %s2492_s13 = int_to_ptr.vmem [resolvable:$true] %s1459_s13 }
 0x46f   : > { %s1991_s20 = scalar_lea.vmem %s2492_s13, 128 }
 0x470   : > { %1093 = vrot.lane.b32.xlu0 %v1107_v26, %s2104_s7  ;;  %1045 = vrot.lane.b32.xlu1 %v1107_v26, %s2605_s14  ;;  %s1643_s7 = sshll.u32 %s2153_s19, 7  ;;  %s1446_s19 = scalar_lea.sflag [#allocation7], %s2319_s26 }
 0x471   : > { %s2490_s27 = scalar_lea.hbm %s2538_s4, %s1643_s7  ;;  %p1992_p1 = scmp.ne.s32.totalorder %s2492_s13, %s1991_s20 }
 0x472   : > { %s1995_s14 = sshll.u32 %s2106_s28, 4  ;;  %s1996_s14 = int_to_ptr.vmem [resolvable:$false] %s1995_s14 }
 0x473   : > { %p1993_p4 = pnand %p1992_p1, %p2274_p6  ;;  %p1998_p3 = scmp.lt.s32.totalorder %s2492_s13, %s1996_s14 }
 0x474   : > { %1189 = vrot.lane.b32.xlu1 %v1107_v26, %s2606_s10  ;;  %s1997_s10 = scalar_lea.vmem %s1996_s14, 256 }
 0x475   : > { %p1994_p8 = pneg %p1993_p4  ;;  %p1999_p7 = scmp.lt.s32.totalorder %s1997_s10, %s1991_s20 }
 0x477   : > { %p2000_p10 = por %p1999_p7, %p1998_p3 }
 0x478   : > { %1061 = vrot.lane.b32.xlu1 %v1107_v26, %s2607_s29 }
 0x479   : > { %p2001_p13 = pnand %p2000_p10, %p1994_p8 }
 0x47c   : > { %1205 = vrot.lane.b32.xlu1 %v1107_v26, %s2608_s6 }
 0x480   : > { %1077 = vrot.lane.b32.xlu1 %v1107_v26, %s2609_s9 }
 0x484   : > { %1221 = vrot.lane.b32.xlu1 %v1107_v26, %s2610_s21 }
 0x488   : > { %1101 = vrot.lane.b32.xlu1 %v1107_v26, %s2611_s5 }
 0x4b6   : > { %v1110_v29 = vpop.permute.xlu1 %1109  ;;  %v1006_v30 = vpop.permute.xlu0 %1005 }
 0x4b7   : > { %v1111_v31 = vrot.slane %v1110_v29, 4  ;;  %v1007_v32 = vrot.slane %v1006_v30, 4 }
 0x4b9   : > { %v1112_v33 = vsel %vm535_vm4, %v1110_v29, %v1111_v31  ;;  %v1008_v34 = vsel %vm327_vm10, %v1006_v30, %v1007_v32  ;;  %vm2613_vm4 = vcmask 973824   ;;  %vm2617_vm10 = vcmask 957440  }
 0x4ba   : > { %1114 = vst [vmem:[#allocation4 + $0x40] sm:$0xf] %v1112_v33  ;;  %1010 = vst [vmem:[#allocation4 + $0xc] sm:$0xf] %v1008_v34  ;;  %v1118_v35 = vpop.permute.xlu1 %1117  ;;  %v1150_v36 = vpop.permute.xlu0 %1149 }
 0x4bb   : > { %v1119_v37 = vrot.slane %v1118_v35, 4  ;;  %v1151_v38 = vrot.slane %v1150_v36, 4 }
 0x4bd   : > { %v1120_v39 = vsel %vm551_vm3, %v1118_v35, %v1119_v37  ;;  %v1152_v40 = vsel %vm615_vm12, %v1150_v36, %v1151_v38  ;;  %vm2612_vm3 = vcmask 1031168   ;;  %vm2619_vm12 = vcmask 809984  }
 0x4be   : > { %1122 = vst [vmem:[#allocation4 + $0x44] sm:$0xf] %v1120_v39  ;;  %1154 = vst [vmem:[#allocation4 + $0x54] sm:$0xf] %v1152_v40  ;;  %v1022_v41 = vpop.permute.xlu0 %1021  ;;  %v990_v42 = vpop.permute.xlu1 %989 }
 0x4bf   : > { %v1023_v43 = vrot.slane %v1022_v41, 4  ;;  %v991_v44 = vrot.slane %v990_v42, 4 }
 0x4c1   : > { %v1024_v45 = vsel %vm359_vm14, %v1022_v41, %v1023_v43  ;;  %v992_v46 = vsel %vm295_vm6, %v990_v42, %v991_v44  ;;  %vm2615_vm6 = vcmask 826368   ;;  %vm2621_vm14 = vcmask 941056  }
 0x4c2   : > { %1026 = vst [vmem:[#allocation4 + $0x14] sm:$0xf] %v1024_v45  ;;  %994 = vst [vmem:[#allocation4 + $0x4] sm:$0xf] %v992_v46  ;;  %v1166_v47 = vpop.permute.xlu0 %1165  ;;  %v1126_v48 = vpop.permute.xlu1 %1125 }
 0x4c3   : > { %v1167_v49 = vrot.slane %v1166_v47, 4  ;;  %v1127_v50 = vrot.slane %v1126_v48, 4 }
 0x4c5   : > { %v1168_v51 = vsel %vm647_vm0, %v1166_v47, %v1167_v49  ;;  %v1128_v52 = vsel %vm567_vm5, %v1126_v48, %v1127_v50  ;;  %v1855_v53 = vld [vmem:[#allocation4 + $0x40] sm:$0xff]   ;;  %vm2614_vm5 = vcmask 883712   ;;  %vm2623_vm0 = vcmask 932864  }
 0x4c6   : > { %1170 = vst [vmem:[#allocation4 + $0x5c] sm:$0xf] %v1168_v51  ;;  %1130 = vst [vmem:[#allocation4 + $0x48] sm:$0xf] %v1128_v52  ;;  %v1038_v54 = vpop.permute.xlu0 %1037  ;;  %v1134_v55 = vpop.permute.xlu1 %1133  ;;  %1699 = vmatprep.subr.bf16.mxu1 %v1855_v53 }
 0x4c7   : > { %v1039_v56 = vrot.slane %v1038_v54, 4  ;;  %v1135_v57 = vrot.slane %v1134_v55, 4 }
 0x4c9   : > { %v1040_v59 = vsel %vm391_vm13, %v1038_v54, %v1039_v56  ;;  %v1136_v60 = vsel %vm583_vm8, %v1134_v55, %v1135_v57  ;;  %v1856_v61 = vld [vmem:[#allocation4] sm:$0xff]   ;;  %vm2616_vm8 = vcmask 1014784   ;;  %vm2620_vm13 = vcmask 998400  }
 0x4ca   : > { %1042 = vst [vmem:[#allocation4 + $0x1c] sm:$0xf] %v1040_v59  ;;  %1138 = vst [vmem:[#allocation4 + $0x4c] sm:$0xf] %v1136_v60  ;;  %v1182_v62 = vpop.permute.xlu0 %1181  ;;  %v998_v63 = vpop.permute.xlu1 %997  ;;  %1700 = vmatpush3.bf16.msra.mxu1 %v1856_v61 }
 0x4cb   : > { %v1183_v7 = vrot.slane %v1182_v62, 4  ;;  %v999_v1 = vrot.slane %v998_v63, 4 }
 0x4cd   : > { %v1184_v2 = vsel %vm679_vm15, %v1182_v62, %v1183_v7  ;;  %v1000_v3 = vsel %vm2612_vm3, %v998_v63, %v999_v1  ;;  %vm2622_vm15 = vcmask 850944   ;;  %vm2628_vm3 = vcmask 801792  }
 0x4ce   : > { %1186 = vst [vmem:[#allocation4 + $0x64] sm:$0xf] %v1184_v2  ;;  %1002 = vst [vmem:[#allocation4 + $0x8] sm:$0xf] %v1000_v3  ;;  %v1054_v0 = vpop.permute.xlu0 %1053  ;;  %v1142_v4 = vpop.permute.xlu1 %1141 }
 0x4cf   : > { %v1055_v5 = vrot.slane %v1054_v0, 4  ;;  %v1143_v6 = vrot.slane %v1142_v4, 4 }
 0x4d1   : > { %v1056_v8 = vsel %vm2613_vm4, %v1054_v0, %v1055_v5  ;;  %v1144_v9 = vsel %vm2614_vm5, %v1142_v4, %v1143_v6  ;;  %v1857_v10 = vld [vmem:[#allocation4 + $0x48] sm:$0xff]   ;;  %vm2629_vm4 = vcmask 924672   ;;  %vm2630_vm5 = vcmask 1043456  }
 0x4d2   : > { %1058 = vst [vmem:[#allocation4 + $0x24] sm:$0xf] %v1056_v8  ;;  %1146 = vst [vmem:[#allocation4 + $0x50] sm:$0xf] %v1144_v9  ;;  %v1198_v11 = vpop.permute.xlu0 %1197  ;;  %v1014_v12 = vpop.permute.xlu1 %1013  ;;  %1701 = vmatprep.subr.bf16.mxu1 %v1857_v10  ;;  %v1623_v10 = vcombine.low %v2442_v27, %v2442_v27 }
 0x4d3   : > { %v1199_v13 = vrot.slane %v1198_v11, 4  ;;  %v1015_v14 = vrot.slane %v1014_v12, 4 }
 0x4d5   : > { %v1200_v15 = vsel %vm2615_vm6, %v1198_v11, %v1199_v13  ;;  %v1016_v16 = vsel %vm2616_vm8, %v1014_v12, %v1015_v14  ;;  %v1858_v17 = vld [vmem:[#allocation4 + $0x8] sm:$0xff]   ;;  %vm2631_vm6 = vmmov %vm2629_vm4 }
 0x4d6   : > { %1202 = vst [vmem:[#allocation4 + $0x6c] sm:$0xf] %v1200_v15  ;;  %1018 = vst [vmem:[#allocation4 + $0x10] sm:$0xf] %v1016_v16  ;;  %v1070_v18 = vpop.permute.xlu0 %1069  ;;  %v1158_v19 = vpop.permute.xlu1 %1157  ;;  %1702 = vmatpush3.bf16.msra.mxu1 %v1858_v17 }
 0x4d7   : > { %v1071_v20 = vrot.slane %v1070_v18, 4  ;;  %v1159_v21 = vrot.slane %v1158_v19, 4 }
 0x4d9   : > { %v1072_v22 = vsel %vm2617_vm10, %v1070_v18, %v1071_v20  ;;  %v1160_v23 = vsel %vm2618_vm11, %v1158_v19, %v1159_v21  ;;  %v1859_v24 = vld [vmem:[#allocation4 + $0x50] sm:$0xff]  }
 0x4da   : > { %1074 = vst [vmem:[#allocation4 + $0x2c] sm:$0xf] %v1072_v22  ;;  %1162 = vst [vmem:[#allocation4 + $0x58] sm:$0xf] %v1160_v23  ;;  %v1214_v25 = vpop.permute.xlu0 %1213  ;;  %v1030_v26 = vpop.permute.xlu1 %1029  ;;  %1703 = vmatprep.subr.bf16.mxu1 %v1859_v24 }
 0x4db   : > { %v1215_v28 = vrot.slane %v1214_v25, 4  ;;  %v1031_v29 = vrot.slane %v1030_v26, 4 }
 0x4dd   : > { %v1216_v30 = vsel %vm2619_vm12, %v1214_v25, %v1215_v28  ;;  %v1032_v31 = vsel %vm2620_vm13, %v1030_v26, %v1031_v29  ;;  %v1860_v32 = vld [vmem:[#allocation4 + $0x10] sm:$0xff]   ;;  %v277_v25 = vld [vmem:[#allocation11 + $0x10] sm:$0xff] }
 0x4de   : > { %1218 = vst [vmem:[#allocation4 + $0x74] sm:$0xf] %v1216_v30  ;;  %1034 = vst [vmem:[#allocation4 + $0x18] sm:$0xf] %v1032_v31  ;;  %v1086_v33 = vpop.permute.xlu0 %1085  ;;  %v1174_v34 = vpop.permute.xlu1 %1173  ;;  %1704 = vmatpush3.bf16.msra.mxu1 %v1860_v32  ;;  %v279_v29 = vld [vmem:[#allocation11 + $0x18] sm:$0xff] }
 0x4df   : > { %v1087_v35 = vrot.slane %v1086_v33, 4  ;;  %v1175_v36 = vrot.slane %v1174_v34, 4  ;;  %v1432_v31 = vld [vmem:[#allocation2] sm:$0xff]  ;;  %v1433_v32 = vld [vmem:[#allocation2 + $0x8] sm:$0xff] }
 0x4e1   : > { %v1088_v37 = vsel %vm2621_vm14, %v1086_v33, %v1087_v35  ;;  %v1176_v38 = vsel %vm2622_vm15, %v1174_v34, %v1175_v36  ;;  %v1861_v39 = vld [vmem:[#allocation4 + $0x58] sm:$0xff]  }
 0x4e2   : > { %1090 = vst [vmem:[#allocation4 + $0x34] sm:$0xf] %v1088_v37  ;;  %1178 = vst [vmem:[#allocation4 + $0x60] sm:$0xf] %v1176_v38  ;;  %v1094_v40 = vpop.permute.xlu0 %1093  ;;  %v1046_v41 = vpop.permute.xlu1 %1045  ;;  %1705 = vmatprep.subr.bf16.mxu1 %v1861_v39 }
 0x4e3   : > { %v1095_v42 = vrot.slane %v1094_v40, 4  ;;  %v1047_v43 = vrot.slane %v1046_v41, 4 }
 0x4e5   : > { %v1096_v44 = vsel %vm2623_vm0, %v1094_v40, %v1095_v42  ;;  %v1048_v45 = vsel %vm407_vm2, %v1046_v41, %v1047_v43  ;;  %v1862_v46 = vld [vmem:[#allocation4 + $0x18] sm:$0xff]   ;;  %vm2626_vm2 = vcmask 818176  }
 0x4e6   : > { %1098 = vst [vmem:[#allocation4 + $0x38] sm:$0xf] %v1096_v44  ;;  %1050 = vst [vmem:[#allocation4 + $0x20] sm:$0xf] %v1048_v45  ;;  %v1190_v47 = vpop.permute.xlu1 %1189  ;;  %1706 = vmatpush3.bf16.msra.mxu1 %v1862_v46 }
 0x4e7   : > { %v1191_v48 = vrot.slane %v1190_v47, 4 }
 0x4e9   : > { %v1192_v49 = vsel %vm2624_vm7, %v1190_v47, %v1191_v48  ;;  %v1863_v50 = vld [vmem:[#allocation4 + $0x60] sm:$0xff]  }
 0x4ea   : > { %1194 = vst [vmem:[#allocation4 + $0x68] sm:$0xf] %v1192_v49  ;;  %v1062_v51 = vpop.permute.xlu1 %1061  ;;  %1707 = vmatprep.subr.bf16.mxu1 %v1863_v50 }
 0x4eb   : > { %v1063_v52 = vrot.slane %v1062_v51, 4 }
 0x4ed   : > { %v1064_v53 = vsel %vm2625_vm9, %v1062_v51, %v1063_v52  ;;  %v1864_v54 = vld [vmem:[#allocation4 + $0x20] sm:$0xff]  }
 0x4ee   : > { %1066 = vst [vmem:[#allocation4 + $0x28] sm:$0xf] %v1064_v53  ;;  %v1206_v55 = vpop.permute.xlu1 %1205  ;;  %1708 = vmatpush3.bf16.msra.mxu1 %v1864_v54 }
 0x4ef   : > { %v1207_v56 = vrot.slane %v1206_v55, 4 }
 0x4f1   : > { %v1208_v57 = vsel %vm2626_vm2, %v1206_v55, %v1207_v56  ;;  %v1865_v59 = vld [vmem:[#allocation4 + $0x68] sm:$0xff]  }
 0x4f2   : > { %1210 = vst [vmem:[#allocation4 + $0x70] sm:$0xf] %v1208_v57  ;;  %v1078_v60 = vpop.permute.xlu1 %1077  ;;  %1709 = vmatprep.subr.bf16.mxu1 %v1865_v59 }
 0x4f3   : > { %v1079_v61 = vrot.slane %v1078_v60, 4 }
 0x4f5   : > { %v1080_v62 = vsel %vm2627_vm1, %v1078_v60, %v1079_v61  ;;  %v1866_v63 = vld [vmem:[#allocation4 + $0x28] sm:$0xff]  }
 0x4f6   : > { %1082 = vst [vmem:[#allocation4 + $0x30] sm:$0xf] %v1080_v62  ;;  %v1222_v7 = vpop.permute.xlu1 %1221  ;;  %1710 = vmatpush3.bf16.msra.mxu1 %v1866_v63 }
 0x4f7   : > { %v1223_v1 = vrot.slane %v1222_v7, 4 }
 0x4f9   : > { %v1224_v2 = vsel %vm2628_vm3, %v1222_v7, %v1223_v1  ;;  %v1867_v3 = vld [vmem:[#allocation4 + $0x70] sm:$0xff]  }
 0x4fa   : > { %1226 = vst [vmem:[#allocation4 + $0x78] sm:$0xf] %v1224_v2  ;;  %v1102_v0 = vpop.permute.xlu1 %1101  ;;  %1711 = vmatprep.subr.bf16.mxu1 %v1867_v3 }
 0x4fb   : > { %v1103_v4 = vrot.slane %v1102_v0, 4 }
 0x4fd   : > { %v1104_v5 = vsel %vm2629_vm4, %v1102_v0, %v1103_v4  ;;  %v1868_v6 = vld [vmem:[#allocation4 + $0x30] sm:$0xff]  }
 0x4fe   : > { %1106 = vst [vmem:[#allocation4 + $0x3c] sm:$0xf] %v1104_v5  ;;  %1712 = vmatpush3.bf16.msra.mxu1 %v1868_v6 }
 0x501   : > { %v1869_v8 = vld [vmem:[#allocation4 + $0x78] ss:$0 sps:$4 sm:$0xff]  }
 0x502   : > { %1722 = vmatprep.subr.msk.bf16.mxu1 %vm2630_vm5, %v1869_v8 }
 0x505   : > { %v1870_v9 = vld [vmem:[#allocation4 + $0x38] sm:$0xff]  }
 0x506   : > { %1714 = vmatpush3.bf16.msra.mxu1 %v1870_v9 }
 0x509   : > { %1397 = vmatmul.mubr.bf16.vlgmr.msra.gmra.mrb[0].mxu1 %v1623_v10 }
 0x5dc   : > { %v1715_v11 = vpop.f32.mrb[0].mxu1 }
 0x5dd   : > { %v1716_v12 = vpop.f32.mrb[1].mxu1 }
 0x5de   : > { %v1717_v13 = vadd.f32 %v1716_v12, %v1715_v11  ;;  %v1718_v14 = vpop.f32.mrb[2].mxu1 }
 0x5df   : > { %v1719_v15 = vpop.f32.mrb[3].mxu1 }
 0x5e0   : > { %v1404_v16 = vmul.f32 %v1717_v13, %v2407_v58 }
 0x5e2   : > { %1405 = vadd.xlane.f32.xlu0 %v1404_v16  ;;  %v1407_v17 = vmul.f32 %v1717_v13, %v1404_v16 }
 0x5e4   : > { %1408 = vadd.xlane.f32.xlu1 %v1407_v17 }
 0x66f   : > { %v1406_v18 = vpop.xlane.xlu0 %1405 }
 0x670   : > { %v1410_v19 = vmul.f32 0.0625, %v1406_v18 }
 0x671   : > { %v1409_v20 = vpop.xlane.xlu1 %1408 }
 0x672   : > { %v1412_v21 = vmul.f32 %v1410_v19, %v1410_v19  ;;  %v1411_v22 = vmul.f32 0.0625, %v1409_v20 }
 0x674   : > { %v1413_v23 = vsub.f32 %v1411_v22, %v1412_v21 }
 0x676   : > { %v1414_v27 = vmax.f32 %v1413_v23, 0.0 }
 0x678   : > { %v1415_v24 = vadd.f32 1e-05, %v1414_v27 }
 0x67a   : > { %1875 = vrsqrt.f32 %v1415_v24 }
 0x684   : > { %v1876_v26 = vpop.eup %1875 }
 0x685   : > { %v1417_v28 = vmul.f32 %v1876_v26, %v277_v25 }
 0x687   : > { %1422 = vperm.xlu0 %1835, %v1417_v28   ;;  %v1418_v58 = vmul.f32 %v1417_v28, %v1410_v19 }
 0x689   : > { %v1419_v30 = vsub.f32 %v279_v29, %v1418_v58 }
 0x68b   : > { %1436 = vrot.lane.b32.xlu0 %v1432_v31, %s2611_s5  ;;  %1428 = vperm.xlu1 %1836, %v1419_v30  }
 0x68f   : > { %1438 = vrot.lane.b32.xlu1 %v1433_v32, %s2611_s5 }
 0x706   : > { %v1423_v33 = vpop.permute.xlu0 %1422 }
 0x707   : > { %v1425_v35 = vmul.f32 %v1717_v13, %v1423_v33 }
 0x70a   : > { %v1429_v34 = vpop.permute.xlu1 %1428  ;;  %v1437_v36 = vpop.permute.xlu0 %1436 }
 0x70b   : > { %v1431_v37 = vadd.f32 %v1429_v34, %v1425_v35 }
 0x70e   : > { %v1439_v38 = vpop.permute.xlu1 %1438 }
 0x70f   : > { %v1441_v39 = vsel %vm2631_vm6, %v1437_v36, %v1439_v38 }
 0x710   : > { %v1443_v40 = vadd.f32 %v1441_v39, %v1431_v37 }
 0x712   : > { %1444 = vst [vmem:[%s252_s24] sm:$0xff] %v1443_v40 }
 0x713   : > { %2004 = shalt.err (!%p2001_p13)
}
 0x714   : > { %s2005_s26 = scalar_lea.hbm %s2490_s27, 128  ;;  %s2009_s9 = scalar_lea.hbm %s2538_s4, 256 }
 0x715   : > { %p2006_p5 = scmp.ne.s32.totalorder %s2490_s27, %s2005_s26  ;;  %p2010_p11 = scmp.lt.u32.totalorder %s2490_s27, %s2538_s4 }
 0x716   : > { %p2011_p12 = scmp.lt.u32.totalorder %s2009_s9, %s2005_s26  ;;  %p2013_p1 = scmp.lt.u32.totalorder %s2005_s26, %s2490_s27 }
 0x717   : > { %p2007_p0 = pnand %p2006_p5, %p2274_p6 }
 0x718   : > { %p2012_p2 = por %p2011_p12, %p2010_p11 }
 0x719   : > { %p2008_p9 = pneg %p2007_p0 }
 0x71a   : > { %p2014_p4 = por %p2013_p1, %p2012_p2 }
 0x71c   : > { %p2015_p8 = pnand %p2014_p4, %p2008_p9 }
 0x71e   : > { %2018 = shalt.err (!%p2015_p8)
}
 0x71f   : > { %1737 = dma.vmem_to_hbm [thread:$0]  (%p2274_p6), %s2492_s13, 128, %s2490_s27, %s1446_s19  }
 0x720 PF: > { %s1471_s25 = sand.u32 1, %s2053_s15   ;;  %p2632_p3 = scmp.ne.s32.totalorder %s2581_s22, 0 }
 0x721   : > { %p2633_p7 = scmp.ge.s32.totalorder %s2065_s18, 2  ;;  %s1472_s7 = scalar_lea.sflag [#allocation7], %s1471_s25 }
 0x723   : > { %p1754_p10 = pnand %p2633_p7, %p2632_p3 }
 0x725   : > { %2048 = dma.done.wait (!%p1754_p10), %s1472_s7, 128  }
 0x726   : > { %2050 = vsyncadd (!%p1754_p10), %s1472_s7, 4294967168  ;;  %p19_p13 = scmp.ge.s32.totalorder %s2260_s8, 4   ;;  %s2634_s15 = smov %s2057_s16 }
 0x727   : > { %s2635_s16 = smov %s2061_s17  ;;  %s2636_s17 = smov %s2270_s11 }
 0x728   : > { %s2637_s18 = smov %s2260_s8  ;;  %21 = sbr.rel (!%p19_p13) target bundleno = 7 (0x7), region = 96 }
 0x72f   :  { %1477 = vsyncpa [#allocation6], 1 }
 0x730   :  { %1479 = vsyncpa [#allocation6 + $0x1], 1 }
 0x731   :  { %1480 = vsyncpa [#allocation9], 1 }
 0x732   :  { %1481 = vsyncpa [#allocation12], 1 }
 0x733   :  { %1482 = vsyncpa [#allocation7], 1 }
 0x734   :  { %1484 = vsyncpa [#allocation7 + $0x1], 1 }

</bundles_post_ra>
